<compile_context>
chip_gen: v7x
topology: tpu7x:2x2x1
jax: 0.10.0
libtpu: 0.0.40
codegen_flags: <defaults>
</compile_context>

<pallas_src>
import jax
import jax.numpy as jnp
from jax.experimental import pallas as pl
from jax.experimental.pallas import tpu as pltpu

ENC = 300
MID = 150
LATENT = 50
N_ACT = 6 + 3          # 9
GP = 128               # gate pitch: each GRU gate gets its own 128-lane slot
W_LANES = 3 * GP       # 384 lanes for the packed parameter slab

# ---- row offsets inside the single packed parameter slab (8-aligned) --------
R_W1 = 0               # [30, 300]   down_sampler.0
R_W2 = 32              # [300, 150]  down_sampler.2
R_WPV = 336            # [150, 128]  policy (cols 0:50) + value (col 50)
R_WIH = 488            # [50, 384]   GRU W_ih, gate-pitched
R_WHH = 544            # [128, 384]  GRU W_hh, gate-pitched (rows 50:128 zero)
R_WL = 672             # [128, 128]  to_logits (rows 0:50, cols 0:9 real)
R_BIAS = 800           # 6 bias rows: b1, b2, bpv, bih_fold, bhh_n, bl
N_ROWS = 808

VMEM_SPEC = pl.BlockSpec(memory_space=pltpu.MemorySpace.VMEM)


# ----------------------------------------------------------------------------
# fused kernel: down_sampler -> policy/value heads -> GRU -> masked softmax
# ----------------------------------------------------------------------------
def _marines_fused_kernel(obs_ref, nbr_ref, avail_ref, slab_ref, out_ref):
    B = obs_ref.shape[0]
    TB = nbr_ref.shape[0]
    T = TB // B

    # ---- parameter views: static slices of the single packed VMEM slab ------
    w1 = slab_ref[R_W1:R_W1 + 30, 0:ENC]
    b1 = slab_ref[R_BIAS + 0:R_BIAS + 1, 0:ENC]
    w2 = slab_ref[R_W2:R_W2 + ENC, 0:MID]
    b2 = slab_ref[R_BIAS + 1:R_BIAS + 2, 0:MID]
    wpv = slab_ref[R_WPV:R_WPV + MID, 0:GP]
    bpv = slab_ref[R_BIAS + 2:R_BIAS + 3, 0:GP]
    wih = slab_ref[R_WIH:R_WIH + LATENT, 0:W_LANES]
    bih = slab_ref[R_BIAS + 3:R_BIAS + 4, 0:W_LANES]    # bhh_r/bhh_z pre-folded
    whh = slab_ref[R_WHH:R_WHH + GP, 0:W_LANES]
    bhn = slab_ref[R_BIAS + 4:R_BIAS + 5, 0:GP]         # n-gate hidden bias
    wl = slab_ref[R_WL:R_WL + GP, 0:GP]
    bl = slab_ref[R_BIAS + 5:R_BIAS + 6, 0:GP]

    # ---- stage 0: down_sampler -> fused policy + value head -----------------
    x = obs_ref[...]
    h1 = jnp.maximum(jnp.dot(x, w1, preferred_element_type=jnp.float32) + b1, 0.0)
    h2 = jnp.maximum(jnp.dot(h1, w2, preferred_element_type=jnp.float32) + b2, 0.0)
    pre = jnp.dot(h2, wpv, preferred_element_type=jnp.float32) + bpv   # [B,128]
    lane = jax.lax.broadcasted_iota(jnp.int32, (B, GP), 1)
    # policy in lanes 0:50, pad lanes forced to exactly 0 -> safe GRU h0
    h0 = jnp.where(lane < LATENT, jnp.maximum(pre, 0.0), 0.0)
    # value = tanh of the fused column 50, packed into lane 50 of segment 0
    seg0 = h0 + jnp.where(lane == LATENT, jnp.tanh(pre), 0.0)

    # ---- stage 1: single-layer GRU (torch gate order r, z, n), h0 = policy --
    # batched input projection: one MXU pass for all T steps; r/z hidden
    # biases are pre-folded into `bih`, so nothing but h @ whh stays serial.
    gi_all = jnp.dot(nbr_ref[...], wih, preferred_element_type=jnp.float32) + bih
    bhn_b = jnp.broadcast_to(bhn, (B, GP))               # hoisted broadcast

    h = h0                                               # [B,128], pad lanes 0
    for t in range(T):                                   # static unroll (T small)
        gi = gi_all[t * B:(t + 1) * B, :]                # contiguous row block
        gh = jnp.dot(h, whh, preferred_element_type=jnp.float32)      # [B,384]
        # sigmoid(x) = 0.5*tanh(0.5*x)+0.5 -> single EUP op per gate
        r = 0.5 * jnp.tanh(0.5 * (gi[:, 0:GP] + gh[:, 0:GP])) + 0.5
        z = 0.5 * jnp.tanh(0.5 * (gi[:, GP:2 * GP] + gh[:, GP:2 * GP])) + 0.5
        n = jnp.tanh(gi[:, 2 * GP:] + r * (gh[:, 2 * GP:] + bhn_b))
        h = n + z * (h - n)                              # == (1-z)*n + z*h

    # ---- stage 2: logits -> mask unavailable -> softmax over padded lanes ---
    logits = jnp.dot(h, wl, preferred_element_type=jnp.float32) + bl   # [B,128]
    logits = jnp.where(avail_ref[...] != 0, logits, jnp.float32(-2.0e10))
    m = jnp.max(logits, axis=-1, keepdims=True)
    e = jnp.exp(logits - m)                              # pad lanes -> exactly 0
    denom = jnp.sum(e, axis=-1, keepdims=True)
    inv = pl.reciprocal(denom, approx=True)              # EUP slot (otherwise idle)
    inv = inv * (2.0 - denom * inv)                      # one NR step -> ~f32 acc
    probs = e * inv

    # ---- single lane-dense [B, 384] output: 3 aligned 128-wide stores -------
    out_ref[:, 0:GP] = seg0                              # policy 0:50, value @50
    out_ref[:, GP:2 * GP] = h                            # latent in lanes 0:50
    out_ref[:, 2 * GP:3 * GP] = probs                    # probs in lanes 0:9


def marines_forward(observation, neighbors, available_actions, params):
    """Fused forward_initial -> forward_communicate -> forward_probs.

    observation        : [B, 30]    f32
    neighbors          : [B, T, 50] f32 (batch_first, as in the PyTorch module)
    available_actions  : [B, 9]     int/bool (nonzero = available)
    returns (policy_dist [B,50], state_vals [B,1], latent [B,50], probs [B,9])
    """
    B, T = neighbors.shape[0], neighbors.shape[1]
    # time-major flatten so the GRU input projection is a single matmul and
    # per-step slices inside the kernel are contiguous row blocks.
    nbr_flat = jnp.swapaxes(neighbors, 0, 1).reshape(T * B, LATENT)
    # availability mask padded to the 128-lane logits tile (pad = unavailable)
    avail_pad = jnp.zeros((B, GP), jnp.int32).at[:, :N_ACT].set(
        available_actions.astype(jnp.int32))

    out = pl.pallas_call(
        _marines_fused_kernel,
        out_shape=jax.ShapeDtypeStruct((B, 3 * GP), jnp.float32),
        in_specs=[VMEM_SPEC] * 4,
        out_specs=VMEM_SPEC,
    )(observation, nbr_flat, avail_pad, params["slab"])

    policy = out[:, 0:LATENT]
    value = out[:, LATENT:LATENT + 1]
    latent = out[:, GP:GP + LATENT]
    probs = out[:, 2 * GP:2 * GP + N_ACT]
    return policy, value, latent, probs


# ----------------------------------------------------------------------------
# parameter init (matches init_params: row-normalized N(0,1) Linear weights,
# zero bias; GRU keeps PyTorch's default uniform(-1/sqrt(H), 1/sqrt(H)))
# ----------------------------------------------------------------------------
def _normalized_linear(key, in_f, out_f):
    w = jax.random.normal(key, (out_f, in_f), jnp.float32)           # torch [out, in]
    w = w / jnp.sqrt(jnp.sum(w * w, axis=1, keepdims=True))          # unit-norm rows
    return w.T, jnp.zeros((1, out_f), jnp.float32)                   # store as [in, out]


def _pack_param_slab(p):
    """Pack all weights/biases into one lane-padded f32 slab [N_ROWS, 384]."""
    slab = jnp.zeros((N_ROWS, W_LANES), jnp.float32)
    slab = slab.at[R_W1:R_W1 + 30, 0:ENC].set(p["w1"])
    slab = slab.at[R_W2:R_W2 + ENC, 0:MID].set(p["w2"])
    # fused policy + value head: policy cols 0:50, value col 50
    slab = slab.at[R_WPV:R_WPV + MID, 0:LATENT].set(p["wp"])
    slab = slab.at[R_WPV:R_WPV + MID, LATENT:LATENT + 1].set(p["wv"])
    # GRU weights, gate-pitched: gate g occupies lanes [g*GP, g*GP + 50)
    for g in range(3):
        slab = slab.at[R_WIH:R_WIH + LATENT, g * GP:g * GP + LATENT].set(
            p["wih"][:, g * LATENT:(g + 1) * LATENT])
        slab = slab.at[R_WHH:R_WHH + LATENT, g * GP:g * GP + LATENT].set(
            p["whh"][:, g * LATENT:(g + 1) * LATENT])  # rows 50:128 stay zero
    # to_logits (rows 0:50, cols 0:9 real; rest zero)
    slab = slab.at[R_WL:R_WL + LATENT, 0:N_ACT].set(p["wl"])
    # biases ------------------------------------------------------------------
    slab = slab.at[R_BIAS + 0, 0:ENC].set(p["b1"][0])
    slab = slab.at[R_BIAS + 1, 0:MID].set(p["b2"][0])
    slab = slab.at[R_BIAS + 2, 0:LATENT].set(p["bp"][0])
    slab = slab.at[R_BIAS + 2, LATENT].set(p["bv"][0, 0])
    bih, bhh = p["bih"][0], p["bhh"][0]
    for g in range(3):
        seg = bih[g * LATENT:(g + 1) * LATENT]
        if g < 2:                                   # fold bhh_r / bhh_z here
            seg = seg + bhh[g * LATENT:(g + 1) * LATENT]
        slab = slab.at[R_BIAS + 3, g * GP:g * GP + LATENT].set(seg)
    # bhh_n must stay inside the r*(...) product -> separate row
    slab = slab.at[R_BIAS + 4, 0:LATENT].set(bhh[2 * LATENT:3 * LATENT])
    slab = slab.at[R_BIAS + 5, 0:N_ACT].set(p["bl"][0])
    return slab


def make_params(key):
    ks = jax.random.split(key, 9)
    p = {}
    p["w1"], p["b1"] = _normalized_linear(ks[0], 30, ENC)
    p["w2"], p["b2"] = _normalized_linear(ks[1], ENC, MID)
    p["wp"], p["bp"] = _normalized_linear(ks[2], MID, LATENT)
    p["wv"], p["bv"] = _normalized_linear(ks[3], MID, 1)
    p["wl"], p["bl"] = _normalized_linear(ks[4], LATENT, N_ACT)

    # GRU: torch default init; gate order (r, z, n) as in torch.nn.GRU
    k = 1.0 / jnp.sqrt(jnp.float32(LATENT))
    wih = jax.random.uniform(ks[5], (3 * LATENT, LATENT), jnp.float32, -k, k)
    whh = jax.random.uniform(ks[6], (3 * LATENT, LATENT), jnp.float32, -k, k)
    bih = jax.random.uniform(ks[7], (3 * LATENT,), jnp.float32, -k, k)
    bhh = jax.random.uniform(ks[8], (3 * LATENT,), jnp.float32, -k, k)
    p["wih"], p["whh"] = wih.T, whh.T                 # [50,150] (x @ W form)
    p["bih"], p["bhh"] = bih.reshape(1, -1), bhh.reshape(1, -1)

    p["slab"] = _pack_param_slab(p)                   # single kernel operand
    return p


# ----------------------------------------------------------------------------
# pure-JAX reference (uses the raw, un-packed weights)
# ----------------------------------------------------------------------------
def ref_forward(obs, neighbors, avail, p):
    h1 = jnp.maximum(obs @ p["w1"] + p["b1"], 0.0)
    h2 = jnp.maximum(h1 @ p["w2"] + p["b2"], 0.0)
    policy = jnp.maximum(h2 @ p["wp"] + p["bp"], 0.0)
    value = jnp.tanh(h2 @ p["wv"] + p["bv"])
    H = LATENT
    h = policy
    for t in range(neighbors.shape[1]):
        x_t = neighbors[:, t, :]
        gi = x_t @ p["wih"] + p["bih"]
        gh = h @ p["whh"] + p["bhh"]
        r = jax.nn.sigmoid(gi[:, :H] + gh[:, :H])
        z = jax.nn.sigmoid(gi[:, H:2 * H] + gh[:, H:2 * H])
        n = jnp.tanh(gi[:, 2 * H:] + r * gh[:, 2 * H:])
        h = (1.0 - z) * n + z * h
    logits = h @ p["wl"] + p["bl"]
    logits = jnp.where(avail != 0, logits, -2.0e10)
    probs = jax.nn.softmax(logits, axis=-1)
    return policy, value, h, probs


if __name__ == "__main__":
    key = jax.random.PRNGKey(0)
    kp, ko, kn, km = jax.random.split(key, 4)

    params = make_params(kp)

    B, T = 2, 4
    observation = jax.random.normal(ko, (B, 30), jnp.float32)
    neighbors = jax.random.normal(kn, (B, T, LATENT), jnp.float32)
    available = (jax.random.uniform(km, (B, N_ACT)) > 0.3).astype(jnp.int32)
    available = available.at[:, 0].set(1)   # keep at least one action available

    policy_dist, state_vals, latent, probs = marines_forward(
        observation, neighbors, available, params)
    jax.block_until_ready((policy_dist, state_vals, latent, probs))

    # reference check (raw weights, un-packed math)
    rp, rv, rl, rpr = ref_forward(observation, neighbors, available, params)
    assert jnp.allclose(policy_dist, rp, atol=1e-4, rtol=1e-4)
    assert jnp.allclose(state_vals, rv, atol=1e-4, rtol=1e-4)
    assert jnp.allclose(latent, rl, atol=1e-4, rtol=1e-4)
    assert jnp.allclose(probs, rpr, atol=1e-4, rtol=1e-4)
    # approx reciprocal + 1 Newton step: sum-to-one holds to well under 1e-4
    assert jnp.allclose(jnp.sum(probs, -1), 1.0, atol=1e-4)

    print("KERNEL_OK")
</pallas_src>

<mosaic_0001>
module attributes {stable_mosaic.version = 11 : i64} {
  func.func @_marines_fused_kernel(%arg0: memref<2x30xf32, #tpu.memory_space<vmem>>, %arg1: memref<8x50xf32, #tpu.memory_space<vmem>>, %arg2: memref<2x128xi32, #tpu.memory_space<vmem>>, %arg3: memref<808x384xf32, #tpu.memory_space<vmem>>, %arg4: memref<2x384xf32, #tpu.memory_space<vmem>>) attributes {dimension_semantics = [], scalar_prefetch = 0 : i64, scratch_operands = 0 : i64, tpu.core_type = #tpu.core_type<tc>} {
    %c0 = arith.constant 0 : index
    %c0_0 = arith.constant 0 : index
    %0 = vector.load %arg3[%c0, %c0_0] : memref<808x384xf32, #tpu.memory_space<vmem>>, vector<30x300xf32>
    %c800 = arith.constant 800 : index
    %c0_1 = arith.constant 0 : index
    %1 = vector.load %arg3[%c800, %c0_1] : memref<808x384xf32, #tpu.memory_space<vmem>>, vector<1x300xf32>
    %c32 = arith.constant 32 : index
    %c0_2 = arith.constant 0 : index
    %2 = vector.load %arg3[%c32, %c0_2] : memref<808x384xf32, #tpu.memory_space<vmem>>, vector<300x150xf32>
    %c801 = arith.constant 801 : index
    %c0_3 = arith.constant 0 : index
    %3 = vector.load %arg3[%c801, %c0_3] : memref<808x384xf32, #tpu.memory_space<vmem>>, vector<1x150xf32>
    %c336 = arith.constant 336 : index
    %c0_4 = arith.constant 0 : index
    %4 = vector.load %arg3[%c336, %c0_4] : memref<808x384xf32, #tpu.memory_space<vmem>>, vector<150x128xf32>
    %c802 = arith.constant 802 : index
    %c0_5 = arith.constant 0 : index
    %5 = vector.load %arg3[%c802, %c0_5] : memref<808x384xf32, #tpu.memory_space<vmem>>, vector<1x128xf32>
    %c488 = arith.constant 488 : index
    %c0_6 = arith.constant 0 : index
    %6 = vector.load %arg3[%c488, %c0_6] : memref<808x384xf32, #tpu.memory_space<vmem>>, vector<50x384xf32>
    %c803 = arith.constant 803 : index
    %c0_7 = arith.constant 0 : index
    %7 = vector.load %arg3[%c803, %c0_7] : memref<808x384xf32, #tpu.memory_space<vmem>>, vector<1x384xf32>
    %c544 = arith.constant 544 : index
    %c0_8 = arith.constant 0 : index
    %8 = vector.load %arg3[%c544, %c0_8] : memref<808x384xf32, #tpu.memory_space<vmem>>, vector<128x384xf32>
    %c804 = arith.constant 804 : index
    %c0_9 = arith.constant 0 : index
    %9 = vector.load %arg3[%c804, %c0_9] : memref<808x384xf32, #tpu.memory_space<vmem>>, vector<1x128xf32>
    %c672 = arith.constant 672 : index
    %c0_10 = arith.constant 0 : index
    %10 = vector.load %arg3[%c672, %c0_10] : memref<808x384xf32, #tpu.memory_space<vmem>>, vector<128x128xf32>
    %c805 = arith.constant 805 : index
    %c0_11 = arith.constant 0 : index
    %11 = vector.load %arg3[%c805, %c0_11] : memref<808x384xf32, #tpu.memory_space<vmem>>, vector<1x128xf32>
    %c0_12 = arith.constant 0 : index
    %c0_13 = arith.constant 0 : index
    %12 = vector.load %arg0[%c0_12, %c0_13] : memref<2x30xf32, #tpu.memory_space<vmem>>, vector<2x30xf32>
    %cst = arith.constant dense<0.000000e+00> : vector<2x300xf32>
    %13 = tpu.matmul %12, %0, %cst {dimension_numbers = #tpu.dot_dimension_numbers<[1], [0], [0], [1], [0, 0, 1, 1], [], []>} : vector<2x30xf32>, vector<30x300xf32>, vector<2x300xf32> -> vector<2x300xf32>
    %14 = vector.broadcast %1 : vector<1x300xf32> to vector<2x300xf32>
    %15 = arith.addf %13, %14 : vector<2x300xf32>
    %cst_14 = arith.constant 0.000000e+00 : f32
    %16 = vector.broadcast %cst_14 : f32 to vector<2x300xf32>
    %17 = arith.maximumf %15, %16 : vector<2x300xf32>
    %cst_15 = arith.constant dense<0.000000e+00> : vector<2x150xf32>
    %18 = tpu.matmul %17, %2, %cst_15 {dimension_numbers = #tpu.dot_dimension_numbers<[1], [0], [0], [1], [0, 0, 1, 1], [], []>} : vector<2x300xf32>, vector<300x150xf32>, vector<2x150xf32> -> vector<2x150xf32>
    %19 = vector.broadcast %3 : vector<1x150xf32> to vector<2x150xf32>
    %20 = arith.addf %18, %19 : vector<2x150xf32>
    %cst_16 = arith.constant 0.000000e+00 : f32
    %21 = vector.broadcast %cst_16 : f32 to vector<2x150xf32>
    %22 = arith.maximumf %20, %21 : vector<2x150xf32>
    %cst_17 = arith.constant dense<0.000000e+00> : vector<2x128xf32>
    %23 = tpu.matmul %22, %4, %cst_17 {dimension_numbers = #tpu.dot_dimension_numbers<[1], [0], [0], [1], [0, 0, 1, 1], [], []>} : vector<2x150xf32>, vector<150x128xf32>, vector<2x128xf32> -> vector<2x128xf32>
    %24 = vector.broadcast %5 : vector<1x128xf32> to vector<2x128xf32>
    %25 = arith.addf %23, %24 : vector<2x128xf32>
    %26 = tpu.iota {dimensions = array<i32: 1>} : vector<2x128xi32>
    %c50_i32 = arith.constant 50 : i32
    %27 = vector.broadcast %c50_i32 : i32 to vector<2x128xi32>
    %28 = arith.cmpi slt, %26, %27 : vector<2x128xi32>
    %cst_18 = arith.constant 0.000000e+00 : f32
    %29 = vector.broadcast %cst_18 : f32 to vector<2x128xf32>
    %30 = arith.maximumf %25, %29 : vector<2x128xf32>
    %cst_19 = arith.constant 0.000000e+00 : f32
    %31 = vector.broadcast %cst_19 : f32 to vector<2x128xf32>
    %32 = arith.select %28, %30, %31 : vector<2x128xi1>, vector<2x128xf32>
    %c50_i32_20 = arith.constant 50 : i32
    %33 = vector.broadcast %c50_i32_20 : i32 to vector<2x128xi32>
    %34 = arith.cmpi eq, %26, %33 : vector<2x128xi32>
    %35 = math.tanh %25 : vector<2x128xf32>
    %cst_21 = arith.constant 0.000000e+00 : f32
    %36 = vector.broadcast %cst_21 : f32 to vector<2x128xf32>
    %37 = arith.select %34, %35, %36 : vector<2x128xi1>, vector<2x128xf32>
    %38 = arith.addf %32, %37 : vector<2x128xf32>
    %c0_22 = arith.constant 0 : index
    %c0_23 = arith.constant 0 : index
    %39 = vector.load %arg1[%c0_22, %c0_23] : memref<8x50xf32, #tpu.memory_space<vmem>>, vector<8x50xf32>
    %cst_24 = arith.constant dense<0.000000e+00> : vector<8x384xf32>
    %40 = tpu.matmul %39, %6, %cst_24 {dimension_numbers = #tpu.dot_dimension_numbers<[1], [0], [0], [1], [0, 0, 1, 1], [], []>} : vector<8x50xf32>, vector<50x384xf32>, vector<8x384xf32> -> vector<8x384xf32>
    %41 = vector.broadcast %7 : vector<1x384xf32> to vector<8x384xf32>
    %42 = arith.addf %40, %41 : vector<8x384xf32>
    %43 = vector.shape_cast %9 : vector<1x128xf32> to vector<1x128xf32>
    %44 = vector.broadcast %43 : vector<1x128xf32> to vector<2x128xf32>
    %45 = vector.extract_strided_slice %42 {offsets = [0, 0], sizes = [2, 384], strides = [1, 1]} : vector<8x384xf32> to vector<2x384xf32>
    %cst_25 = arith.constant dense<0.000000e+00> : vector<2x384xf32>
    %46 = tpu.matmul %32, %8, %cst_25 {dimension_numbers = #tpu.dot_dimension_numbers<[1], [0], [0], [1], [0, 0, 1, 1], [], []>} : vector<2x128xf32>, vector<128x384xf32>, vector<2x384xf32> -> vector<2x384xf32>
    %47 = vector.extract_strided_slice %45 {offsets = [0, 0], sizes = [2, 128], strides = [1, 1]} : vector<2x384xf32> to vector<2x128xf32>
    %48 = vector.extract_strided_slice %46 {offsets = [0, 0], sizes = [2, 128], strides = [1, 1]} : vector<2x384xf32> to vector<2x128xf32>
    %49 = arith.addf %47, %48 : vector<2x128xf32>
    %cst_26 = arith.constant 5.000000e-01 : f32
    %50 = vector.broadcast %cst_26 : f32 to vector<2x128xf32>
    %51 = arith.mulf %50, %49 : vector<2x128xf32>
    %52 = math.tanh %51 : vector<2x128xf32>
    %cst_27 = arith.constant 5.000000e-01 : f32
    %53 = vector.broadcast %cst_27 : f32 to vector<2x128xf32>
    %54 = arith.mulf %53, %52 : vector<2x128xf32>
    %cst_28 = arith.constant 5.000000e-01 : f32
    %55 = vector.broadcast %cst_28 : f32 to vector<2x128xf32>
    %56 = arith.addf %54, %55 : vector<2x128xf32>
    %57 = vector.extract_strided_slice %45 {offsets = [0, 128], sizes = [2, 128], strides = [1, 1]} : vector<2x384xf32> to vector<2x128xf32>
    %58 = vector.extract_strided_slice %46 {offsets = [0, 128], sizes = [2, 128], strides = [1, 1]} : vector<2x384xf32> to vector<2x128xf32>
    %59 = arith.addf %57, %58 : vector<2x128xf32>
    %cst_29 = arith.constant 5.000000e-01 : f32
    %60 = vector.broadcast %cst_29 : f32 to vector<2x128xf32>
    %61 = arith.mulf %60, %59 : vector<2x128xf32>
    %62 = math.tanh %61 : vector<2x128xf32>
    %cst_30 = arith.constant 5.000000e-01 : f32
    %63 = vector.broadcast %cst_30 : f32 to vector<2x128xf32>
    %64 = arith.mulf %63, %62 : vector<2x128xf32>
    %cst_31 = arith.constant 5.000000e-01 : f32
    %65 = vector.broadcast %cst_31 : f32 to vector<2x128xf32>
    %66 = arith.addf %64, %65 : vector<2x128xf32>
    %67 = vector.extract_strided_slice %45 {offsets = [0, 256], sizes = [2, 128], strides = [1, 1]} : vector<2x384xf32> to vector<2x128xf32>
    %68 = vector.extract_strided_slice %46 {offsets = [0, 256], sizes = [2, 128], strides = [1, 1]} : vector<2x384xf32> to vector<2x128xf32>
    %69 = arith.addf %68, %44 : vector<2x128xf32>
    %70 = arith.mulf %56, %69 : vector<2x128xf32>
    %71 = arith.addf %67, %70 : vector<2x128xf32>
    %72 = math.tanh %71 : vector<2x128xf32>
    %73 = arith.subf %32, %72 : vector<2x128xf32>
    %74 = arith.mulf %66, %73 : vector<2x128xf32>
    %75 = arith.addf %72, %74 : vector<2x128xf32>
    %76 = vector.extract_strided_slice %42 {offsets = [2, 0], sizes = [2, 384], strides = [1, 1]} : vector<8x384xf32> to vector<2x384xf32>
    %cst_32 = arith.constant dense<0.000000e+00> : vector<2x384xf32>
    %77 = tpu.matmul %75, %8, %cst_32 {dimension_numbers = #tpu.dot_dimension_numbers<[1], [0], [0], [1], [0, 0, 1, 1], [], []>} : vector<2x128xf32>, vector<128x384xf32>, vector<2x384xf32> -> vector<2x384xf32>
    %78 = vector.extract_strided_slice %76 {offsets = [0, 0], sizes = [2, 128], strides = [1, 1]} : vector<2x384xf32> to vector<2x128xf32>
    %79 = vector.extract_strided_slice %77 {offsets = [0, 0], sizes = [2, 128], strides = [1, 1]} : vector<2x384xf32> to vector<2x128xf32>
    %80 = arith.addf %78, %79 : vector<2x128xf32>
    %cst_33 = arith.constant 5.000000e-01 : f32
    %81 = vector.broadcast %cst_33 : f32 to vector<2x128xf32>
    %82 = arith.mulf %81, %80 : vector<2x128xf32>
    %83 = math.tanh %82 : vector<2x128xf32>
    %cst_34 = arith.constant 5.000000e-01 : f32
    %84 = vector.broadcast %cst_34 : f32 to vector<2x128xf32>
    %85 = arith.mulf %84, %83 : vector<2x128xf32>
    %cst_35 = arith.constant 5.000000e-01 : f32
    %86 = vector.broadcast %cst_35 : f32 to vector<2x128xf32>
    %87 = arith.addf %85, %86 : vector<2x128xf32>
    %88 = vector.extract_strided_slice %76 {offsets = [0, 128], sizes = [2, 128], strides = [1, 1]} : vector<2x384xf32> to vector<2x128xf32>
    %89 = vector.extract_strided_slice %77 {offsets = [0, 128], sizes = [2, 128], strides = [1, 1]} : vector<2x384xf32> to vector<2x128xf32>
    %90 = arith.addf %88, %89 : vector<2x128xf32>
    %cst_36 = arith.constant 5.000000e-01 : f32
    %91 = vector.broadcast %cst_36 : f32 to vector<2x128xf32>
    %92 = arith.mulf %91, %90 : vector<2x128xf32>
    %93 = math.tanh %92 : vector<2x128xf32>
    %cst_37 = arith.constant 5.000000e-01 : f32
    %94 = vector.broadcast %cst_37 : f32 to vector<2x128xf32>
    %95 = arith.mulf %94, %93 : vector<2x128xf32>
    %cst_38 = arith.constant 5.000000e-01 : f32
    %96 = vector.broadcast %cst_38 : f32 to vector<2x128xf32>
    %97 = arith.addf %95, %96 : vector<2x128xf32>
    %98 = vector.extract_strided_slice %76 {offsets = [0, 256], sizes = [2, 128], strides = [1, 1]} : vector<2x384xf32> to vector<2x128xf32>
    %99 = vector.extract_strided_slice %77 {offsets = [0, 256], sizes = [2, 128], strides = [1, 1]} : vector<2x384xf32> to vector<2x128xf32>
    %100 = arith.addf %99, %44 : vector<2x128xf32>
    %101 = arith.mulf %87, %100 : vector<2x128xf32>
    %102 = arith.addf %98, %101 : vector<2x128xf32>
    %103 = math.tanh %102 : vector<2x128xf32>
    %104 = arith.subf %75, %103 : vector<2x128xf32>
    %105 = arith.mulf %97, %104 : vector<2x128xf32>
    %106 = arith.addf %103, %105 : vector<2x128xf32>
    %107 = vector.extract_strided_slice %42 {offsets = [4, 0], sizes = [2, 384], strides = [1, 1]} : vector<8x384xf32> to vector<2x384xf32>
    %cst_39 = arith.constant dense<0.000000e+00> : vector<2x384xf32>
    %108 = tpu.matmul %106, %8, %cst_39 {dimension_numbers = #tpu.dot_dimension_numbers<[1], [0], [0], [1], [0, 0, 1, 1], [], []>} : vector<2x128xf32>, vector<128x384xf32>, vector<2x384xf32> -> vector<2x384xf32>
    %109 = vector.extract_strided_slice %107 {offsets = [0, 0], sizes = [2, 128], strides = [1, 1]} : vector<2x384xf32> to vector<2x128xf32>
    %110 = vector.extract_strided_slice %108 {offsets = [0, 0], sizes = [2, 128], strides = [1, 1]} : vector<2x384xf32> to vector<2x128xf32>
    %111 = arith.addf %109, %110 : vector<2x128xf32>
    %cst_40 = arith.constant 5.000000e-01 : f32
    %112 = vector.broadcast %cst_40 : f32 to vector<2x128xf32>
    %113 = arith.mulf %112, %111 : vector<2x128xf32>
    %114 = math.tanh %113 : vector<2x128xf32>
    %cst_41 = arith.constant 5.000000e-01 : f32
    %115 = vector.broadcast %cst_41 : f32 to vector<2x128xf32>
    %116 = arith.mulf %115, %114 : vector<2x128xf32>
    %cst_42 = arith.constant 5.000000e-01 : f32
    %117 = vector.broadcast %cst_42 : f32 to vector<2x128xf32>
    %118 = arith.addf %116, %117 : vector<2x128xf32>
    %119 = vector.extract_strided_slice %107 {offsets = [0, 128], sizes = [2, 128], strides = [1, 1]} : vector<2x384xf32> to vector<2x128xf32>
    %120 = vector.extract_strided_slice %108 {offsets = [0, 128], sizes = [2, 128], strides = [1, 1]} : vector<2x384xf32> to vector<2x128xf32>
    %121 = arith.addf %119, %120 : vector<2x128xf32>
    %cst_43 = arith.constant 5.000000e-01 : f32
    %122 = vector.broadcast %cst_43 : f32 to vector<2x128xf32>
    %123 = arith.mulf %122, %121 : vector<2x128xf32>
    %124 = math.tanh %123 : vector<2x128xf32>
    %cst_44 = arith.constant 5.000000e-01 : f32
    %125 = vector.broadcast %cst_44 : f32 to vector<2x128xf32>
    %126 = arith.mulf %125, %124 : vector<2x128xf32>
    %cst_45 = arith.constant 5.000000e-01 : f32
    %127 = vector.broadcast %cst_45 : f32 to vector<2x128xf32>
    %128 = arith.addf %126, %127 : vector<2x128xf32>
    %129 = vector.extract_strided_slice %107 {offsets = [0, 256], sizes = [2, 128], strides = [1, 1]} : vector<2x384xf32> to vector<2x128xf32>
    %130 = vector.extract_strided_slice %108 {offsets = [0, 256], sizes = [2, 128], strides = [1, 1]} : vector<2x384xf32> to vector<2x128xf32>
    %131 = arith.addf %130, %44 : vector<2x128xf32>
    %132 = arith.mulf %118, %131 : vector<2x128xf32>
    %133 = arith.addf %129, %132 : vector<2x128xf32>
    %134 = math.tanh %133 : vector<2x128xf32>
    %135 = arith.subf %106, %134 : vector<2x128xf32>
    %136 = arith.mulf %128, %135 : vector<2x128xf32>
    %137 = arith.addf %134, %136 : vector<2x128xf32>
    %138 = vector.extract_strided_slice %42 {offsets = [6, 0], sizes = [2, 384], strides = [1, 1]} : vector<8x384xf32> to vector<2x384xf32>
    %cst_46 = arith.constant dense<0.000000e+00> : vector<2x384xf32>
    %139 = tpu.matmul %137, %8, %cst_46 {dimension_numbers = #tpu.dot_dimension_numbers<[1], [0], [0], [1], [0, 0, 1, 1], [], []>} : vector<2x128xf32>, vector<128x384xf32>, vector<2x384xf32> -> vector<2x384xf32>
    %140 = vector.extract_strided_slice %138 {offsets = [0, 0], sizes = [2, 128], strides = [1, 1]} : vector<2x384xf32> to vector<2x128xf32>
    %141 = vector.extract_strided_slice %139 {offsets = [0, 0], sizes = [2, 128], strides = [1, 1]} : vector<2x384xf32> to vector<2x128xf32>
    %142 = arith.addf %140, %141 : vector<2x128xf32>
    %cst_47 = arith.constant 5.000000e-01 : f32
    %143 = vector.broadcast %cst_47 : f32 to vector<2x128xf32>
    %144 = arith.mulf %143, %142 : vector<2x128xf32>
    %145 = math.tanh %144 : vector<2x128xf32>
    %cst_48 = arith.constant 5.000000e-01 : f32
    %146 = vector.broadcast %cst_48 : f32 to vector<2x128xf32>
    %147 = arith.mulf %146, %145 : vector<2x128xf32>
    %cst_49 = arith.constant 5.000000e-01 : f32
    %148 = vector.broadcast %cst_49 : f32 to vector<2x128xf32>
    %149 = arith.addf %147, %148 : vector<2x128xf32>
    %150 = vector.extract_strided_slice %138 {offsets = [0, 128], sizes = [2, 128], strides = [1, 1]} : vector<2x384xf32> to vector<2x128xf32>
    %151 = vector.extract_strided_slice %139 {offsets = [0, 128], sizes = [2, 128], strides = [1, 1]} : vector<2x384xf32> to vector<2x128xf32>
    %152 = arith.addf %150, %151 : vector<2x128xf32>
    %cst_50 = arith.constant 5.000000e-01 : f32
    %153 = vector.broadcast %cst_50 : f32 to vector<2x128xf32>
    %154 = arith.mulf %153, %152 : vector<2x128xf32>
    %155 = math.tanh %154 : vector<2x128xf32>
    %cst_51 = arith.constant 5.000000e-01 : f32
    %156 = vector.broadcast %cst_51 : f32 to vector<2x128xf32>
    %157 = arith.mulf %156, %155 : vector<2x128xf32>
    %cst_52 = arith.constant 5.000000e-01 : f32
    %158 = vector.broadcast %cst_52 : f32 to vector<2x128xf32>
    %159 = arith.addf %157, %158 : vector<2x128xf32>
    %160 = vector.extract_strided_slice %138 {offsets = [0, 256], sizes = [2, 128], strides = [1, 1]} : vector<2x384xf32> to vector<2x128xf32>
    %161 = vector.extract_strided_slice %139 {offsets = [0, 256], sizes = [2, 128], strides = [1, 1]} : vector<2x384xf32> to vector<2x128xf32>
    %162 = arith.addf %161, %44 : vector<2x128xf32>
    %163 = arith.mulf %149, %162 : vector<2x128xf32>
    %164 = arith.addf %160, %163 : vector<2x128xf32>
    %165 = math.tanh %164 : vector<2x128xf32>
    %166 = arith.subf %137, %165 : vector<2x128xf32>
    %167 = arith.mulf %159, %166 : vector<2x128xf32>
    %168 = arith.addf %165, %167 : vector<2x128xf32>
    %cst_53 = arith.constant dense<0.000000e+00> : vector<2x128xf32>
    %169 = tpu.matmul %168, %10, %cst_53 {dimension_numbers = #tpu.dot_dimension_numbers<[1], [0], [0], [1], [0, 0, 1, 1], [], []>} : vector<2x128xf32>, vector<128x128xf32>, vector<2x128xf32> -> vector<2x128xf32>
    %170 = vector.broadcast %11 : vector<1x128xf32> to vector<2x128xf32>
    %171 = arith.addf %169, %170 : vector<2x128xf32>
    %c0_54 = arith.constant 0 : index
    %c0_55 = arith.constant 0 : index
    %172 = vector.load %arg2[%c0_54, %c0_55] : memref<2x128xi32, #tpu.memory_space<vmem>>, vector<2x128xi32>
    %c0_i32 = arith.constant 0 : i32
    %173 = vector.broadcast %c0_i32 : i32 to vector<2x128xi32>
    %174 = arith.cmpi ne, %172, %173 : vector<2x128xi32>
    %cst_56 = arith.constant -2.000000e+10 : f32
    %175 = vector.broadcast %cst_56 : f32 to vector<2x128xf32>
    %176 = arith.select %174, %171, %175 : vector<2x128xi1>, vector<2x128xf32>
    %cst_57 = arith.constant dense<0xFF800000> : vector<2xf32>
    %177 = vector.multi_reduction <maximumf>, %176, %cst_57 [1] : vector<2x128xf32> to vector<2xf32>
    %178 = vector.shape_cast %177 : vector<2xf32> to vector<2x1xf32>
    %179 = vector.broadcast %178 : vector<2x1xf32> to vector<2x128xf32>
    %180 = arith.subf %176, %179 : vector<2x128xf32>
    %181 = math.exp %180 : vector<2x128xf32>
    %cst_58 = arith.constant dense<0.000000e+00> : vector<2xf32>
    %182 = vector.multi_reduction <add>, %181, %cst_58 [1] : vector<2x128xf32> to vector<2xf32>
    %183 = vector.shape_cast %182 : vector<2xf32> to vector<2x1xf32>
    %184 = tpu.reciprocal %183 {approx = true} : vector<2x1xf32> -> vector<2x1xf32>
    %185 = arith.mulf %183, %184 : vector<2x1xf32>
    %cst_59 = arith.constant 2.000000e+00 : f32
    %186 = vector.broadcast %cst_59 : f32 to vector<2x1xf32>
    %187 = arith.subf %186, %185 : vector<2x1xf32>
    %188 = arith.mulf %184, %187 : vector<2x1xf32>
    %189 = vector.broadcast %188 : vector<2x1xf32> to vector<2x128xf32>
    %190 = arith.mulf %181, %189 : vector<2x128xf32>
    %c0_60 = arith.constant 0 : index
    %c0_61 = arith.constant 0 : index
    %191 = vector.load %arg4[%c0_60, %c0_61] : memref<2x384xf32, #tpu.memory_space<vmem>>, vector<2x128xf32>
    tpu.vector_store %arg4[%c0_60, %c0_61], %38 {strides = array<i32>} : memref<2x384xf32, #tpu.memory_space<vmem>>, vector<2x128xf32>,
    %c0_62 = arith.constant 0 : index
    %c128 = arith.constant 128 : index
    %192 = vector.load %arg4[%c0_62, %c128] : memref<2x384xf32, #tpu.memory_space<vmem>>, vector<2x128xf32>
    tpu.vector_store %arg4[%c0_62, %c128], %168 {strides = array<i32>} : memref<2x384xf32, #tpu.memory_space<vmem>>, vector<2x128xf32>,
    %c0_63 = arith.constant 0 : index
    %c256 = arith.constant 256 : index
    %193 = vector.load %arg4[%c0_63, %c256] : memref<2x384xf32, #tpu.memory_space<vmem>>, vector<2x128xf32>
    tpu.vector_store %arg4[%c0_63, %c256], %190 {strides = array<i32>} : memref<2x384xf32, #tpu.memory_space<vmem>>, vector<2x128xf32>,
    return
  }
}

</mosaic_0001>

<bundles_post_ra>
// kernel: tpu_custom_call.1
= control target key start
LH: loop header
LB: loop body
LE: loop exit
PB: predicated region body
PF: predicated region fallthrough
CT: control target
= control target key end

     0   :  { %9 = vsyncpa [#allocation3], 0  ;;  %s2948_s0 = inlined_call_operand.hbm [shape: f32[2,30], index: 0, kind: input, shape index: {}]   ;;  %s2949_s1 = inlined_call_operand.hbm [shape: f32[8,50], index: 1, kind: input, shape index: {}]   ;;  %s2950_s2 = inlined_call_operand.hbm [shape: s32[2,128], index: 2, kind: input, shape index: {}]   ;;  %s2951_s3 = inlined_call_operand.hbm [shape: f32[808,384], index: 3, kind: input, shape index: {}]   ;;  %s2952_s4 = inlined_call_operand.hbm [shape: f32[2,384], index: 4, kind: output, shape index: {}]  }
   0x1   :  { %10 = vsyncpa [#allocation6], 0 }
   0x2   :  { %11 = vsyncpa [#allocation9], 0 }
   0x3   :  { %12 = vsyncpa [#allocation4], 0  ;;  %s2543_s15 = smov [#allocation5]   ;;  %s2544_s17 = smov [#allocation2]  }
   0x4   :  { %s29_s16 = sshll.u32 %s2543_s15, 4  ;;  %s19_s18 = sshll.u32 %s2544_s17, 4  ;;  %s30_s16 = int_to_ptr.vmem [resolvable:$true] %s29_s16  ;;  %s20_s18 = int_to_ptr.vmem [resolvable:$true] %s19_s18 }
   0x5   :  { %s2425_s21 = scalar_lea.hbm %s2949_s1, 128 }
   0x6   :  { %p2426_p0 = scmp.ne.s32.totalorder %s2949_s1, %s2425_s21  ;;  %p2429_p1 = scmp.lt.u32.totalorder %s2425_s21, %s2949_s1 }
   0x8   :  { %p2431_p2 = pnand %p2429_p1, %p2426_p0 }
   0xa   :  { %2434 = shalt.err (!%p2431_p2)
}
   0xb   :  { %s2435_s26 = scalar_lea.vmem %s30_s16, 128  ;;  %p2440_p4 = scmp.lt.s32.totalorder %s30_s16, %s30_s16 }
   0xc   :  { %p2436_p3 = scmp.ne.s32.totalorder %s30_s16, %s2435_s26  ;;  %p2441_p5 = scmp.lt.s32.totalorder %s2435_s26, %s2435_s26 }
   0xe   :  { %p2442_p6 = por %p2441_p5, %p2440_p4 }
  0x10   :  { %p2443_p7 = pnand %p2442_p6, %p2436_p3 }
  0x12   :  { %2446 = shalt.err (!%p2443_p7)
}
  0x13   :  { %32 = dma.hbm_to_vmem [thread:$0]  %s2949_s1, 128, %s30_s16, [#allocation6]  }
  0x14   :  { %s2447_s5 = scalar_lea.hbm %s2948_s0, 32 }
  0x15   :  { %p2448_p8 = scmp.ne.s32.totalorder %s2948_s0, %s2447_s5  ;;  %p2451_p9 = scmp.lt.u32.totalorder %s2447_s5, %s2948_s0 }
  0x17   :  { %p2453_p10 = pnand %p2451_p9, %p2448_p8 }
  0x19   :  { %2456 = shalt.err (!%p2453_p10)
}
  0x1a   :  { %s2457_s10 = scalar_lea.vmem %s20_s18, 32  ;;  %p2462_p12 = scmp.lt.s32.totalorder %s20_s18, %s20_s18 }
  0x1b   :  { %p2458_p11 = scmp.ne.s32.totalorder %s20_s18, %s2457_s10  ;;  %p2463_p13 = scmp.lt.s32.totalorder %s2457_s10, %s2457_s10 }
  0x1d   :  { %p2464_p0 = por %p2463_p13, %p2462_p12 }
  0x1f   :  { %p2465_p1 = pnand %p2464_p0, %p2458_p11 }
  0x21   :  { %2468 = shalt.err (!%p2465_p1)
}
  0x22   :  { %22 = dma.hbm_to_vmem [thread:$0]  %s2948_s0, 32, %s20_s18, [#allocation3]  }
  0x23   :  { %s2545_s12 = smov [#allocation7]   ;;  %s2546_s14 = smov [#allocation8]  }
  0x24   :  { %s39_s13 = sshll.u32 %s2545_s12, 4  ;;  %s48_s15 = sshll.u32 %s2546_s14, 4  ;;  %s40_s13 = int_to_ptr.vmem [resolvable:$true] %s39_s13  ;;  %s2604_s15 = int_to_ptr.vmem [resolvable:$true] %s48_s15 }
  0x25   :  { %s2469_s19 = scalar_lea.hbm %s2950_s2, 32 }
  0x26   :  { %p2470_p2 = scmp.ne.s32.totalorder %s2950_s2, %s2469_s19  ;;  %p2473_p3 = scmp.lt.u32.totalorder %s2469_s19, %s2950_s2 }
  0x28   :  { %p2475_p4 = pnand %p2473_p3, %p2470_p2 }
  0x2a   :  { %2478 = shalt.err (!%p2475_p4)
}
  0x2b   :  { %s2479_s0 = scalar_lea.vmem %s40_s13, 32  ;;  %p2484_p6 = scmp.lt.s32.totalorder %s40_s13, %s40_s13 }
  0x2c   :  { %p2480_p5 = scmp.ne.s32.totalorder %s40_s13, %s2479_s0  ;;  %p2485_p7 = scmp.lt.s32.totalorder %s2479_s0, %s2479_s0 }
  0x2e   :  { %p2486_p8 = por %p2485_p7, %p2484_p6 }
  0x30   :  { %p2487_p9 = pnand %p2486_p8, %p2480_p5 }
  0x32   :  { %2490 = shalt.err (!%p2487_p9)
}
  0x33   :  { %42 = dma.hbm_to_vmem [thread:$0]  %s2950_s2, 32, %s40_s13, [#allocation6]  }
  0x34   :  { %s2491_s27 = scalar_lea.hbm %s2951_s3, 38784 }
  0x35   :  { %p2492_p10 = scmp.ne.s32.totalorder %s2951_s3, %s2491_s27  ;;  %p2495_p11 = scmp.lt.u32.totalorder %s2491_s27, %s2951_s3 }
  0x37   :  { %p2497_p12 = pnand %p2495_p11, %p2492_p10 }
  0x39   :  { %2500 = shalt.err (!%p2497_p12)
}
  0x3a   :  { %s2501_s6 = scalar_lea.vmem %s2604_s15, 38784  ;;  %p2506_p0 = scmp.lt.s32.totalorder %s2604_s15, %s2604_s15 }
  0x3b   :  { %p2502_p13 = scmp.ne.s32.totalorder %s2604_s15, %s2501_s6  ;;  %p2507_p1 = scmp.lt.s32.totalorder %s2501_s6, %s2501_s6 }
  0x3d   :  { %p2508_p2 = por %p2507_p1, %p2506_p0 }
  0x3f   :  { %p2509_p3 = pnand %p2508_p2, %p2502_p13 }
  0x41   :  { %2512 = shalt.err (!%p2509_p3)
}
  0x42   :  { %s2547_s2 = smov 384   ;;  %s2548_s7 = smov 24  }
  0x43   :  { %54 = dma.hbm_to_vmem [thread:$0]  %s2951_s3, 38784, %s2604_s15, [#allocation9], %s2547_s2, %s2547_s2, %s2548_s7  }
  0x44   :  { %2535 = dma.done.wait [#allocation3], 32  }
  0x45   :  { %2536 = vsyncadd [#allocation3], 4294967264 }
  0x46   :  { %2537 = dma.done.wait [#allocation6], 160  }
  0x47   :  { %2538 = vsyncadd [#allocation6], 4294967136 }
  0x48   :  { %2539 = dma.done.wait [#allocation9], 38784  }
  0x49   :  { %2540 = vsyncadd [#allocation9], 4294928512  ;;  %v2549_v0 = vmov 0.0   ;;  %v2550_v1 = vmov 0.0|0.0   ;;  %vm289_vm0 = vcmask 1045504   ;;  %v68_v2 = vld [vmem:[#allocation8 + $0x8] sm:$0xff] }
  0x4a   :  { %363 = vmatprep.mubr.f32.mxu0 %v2549_v0  ;;  %2083 = vmatprep.subr.bf16.mxu1 %v2550_v1  ;;  %v71_v3 = vld [vmem:[#allocation8 + $0x20] sm:$0xff]  ;;  %v70_v6 = vld [vmem:[#allocation8 + $0x18] sm:$0xff]  ;;  %v77_v8 = vld [vmem:[#allocation8 + $0x50] sm:$0x3f]  ;;  %vm2551_vm1 = vmmov 1   ;;  %vm285_vm3 = vcmask 244736  }
  0x4b   :  { %v67_v4 = vld [vmem:[#allocation8] sm:$0xff]  ;;  %v1988_v5 = vpack.c.bf16 %v71_v3, %v68_v2  ;;  %v74_v7 = vld [vmem:[#allocation8 + $0x38] sm:$0xff]  ;;  %vm2639_vm2 = vmpackc.low %vm289_vm0, %vm2551_vm1  ;;  %vm2552_vm4 = vmmov 0   ;;  %vm458_vm5 = vcmask 1043456   ;;  %vm454_vm7 = vcmask 359424   ;;  %s2554_s3 = smov [#allocation10]  }
  0x4c   :  { %v1990_v9 = vpack.c.bf16 %v70_v6, %v67_v4  ;;  %v1992_v10 = vpack.c.bf16 %v77_v8, %v74_v7  ;;  %v73_v12 = vld [vmem:[#allocation8 + $0x30] sm:$0xff]  ;;  %v76_v13 = vld [vmem:[#allocation8 + $0x48] sm:$0x3f]  ;;  %v75_v19 = vld [vmem:[#allocation8 + $0x40] sm:$0xff]  ;;  %vm609_vm8 = vcmask 179200   ;;  %vm716_vm9 = vcmask 1041408  }
  0x4d   :  { %1989 = vmatprep.subr.bf16.mxu0 %v1988_v5  ;;  %v1995_v14 = vpack.c.bf16 %v76_v13, %v73_v12  ;;  %v69_v15 = vld [vmem:[#allocation8 + $0x10] sm:$0xff]  ;;  %v72_v16 = vld [vmem:[#allocation8 + $0x28] sm:$0xff]  ;;  %v78_v20 = vld [vmem:[#allocation8 + $0x58] sm:$0x3f]  ;;  %vm712_vm10 = vcmask 408576   ;;  %s1659_s10 = sshll.u32 %s2554_s3, 4  ;;  %s1660_s10 = int_to_ptr.vmem [resolvable:$true] %s1659_s10 }
  0x4e   :  { %1991 = vmatpush1.bf16.msra.mxu0 %v1990_v9  ;;  %v268_v17 = vld [vmem:[#allocation2] sm:$0x3]  ;;  %v1999_v18 = vpack.c.bf16 %v72_v16, %v69_v15  ;;  %v82_v21 = vld [vmem:[#allocation8 + $0x68] sm:$0xff]  ;;  %v84_v22 = vld [vmem:[#allocation8 + $0x80] sm:$0xff]  ;;  %v2002_v23 = vpack.c.bf16 %v78_v20, %v75_v19  ;;  %s2513_s1 = scalar_lea.vmem %s1660_s10, 96  ;;  %p2518_p5 = scmp.lt.s32.totalorder %s1660_s10, %s1660_s10 }
  0x4f   :  { %1994 = vmatprep.subr.msk.bf16.mxu0 %vm2639_vm2, %v1992_v10  ;;  %v2005_v24 = vpack.c.bf16 %v84_v22, %v82_v21  ;;  %v81_v25 = vld [vmem:[#allocation8 + $0x60] sm:$0xff]  ;;  %v83_v26 = vld [vmem:[#allocation8 + $0x78] sm:$0xff]  ;;  %v88_v28 = vld [vmem:[#allocation8 + $0xb0] sm:$0xff]  ;;  %p2514_p4 = scmp.ne.s32.totalorder %s1660_s10, %s2513_s1  ;;  %p2519_p6 = scmp.lt.s32.totalorder %s2513_s1, %s2513_s1 }
  0x50   :  { %v86_v27 = vld [vmem:[#allocation8 + $0x98] sm:$0xff]  ;;  %v2007_v29 = vpack.c.bf16 %v83_v26, %v81_v25  ;;  %v85_v31 = vld [vmem:[#allocation8 + $0x90] sm:$0xff]  ;;  %v87_v32 = vld [vmem:[#allocation8 + $0xa8] sm:$0xff] }
  0x51   :  { %v2009_v30 = vpack.c.bf16 %v88_v28, %v86_v27  ;;  %v90_v33 = vld [vmem:[#allocation8 + $0xc8] sm:$0xff]  ;;  %v92_v34 = vld [vmem:[#allocation8 + $0xe0] sm:$0xff]  ;;  %v2011_v35 = vpack.c.bf16 %v87_v32, %v85_v31  ;;  %v91_v38 = vld [vmem:[#allocation8 + $0xd8] sm:$0xff]  ;;  %p2520_p7 = por %p2519_p6, %p2518_p5 }
  0x52   :  { %1997 = vmatpush1.bf16.msk.msra.mxu0 %vm2639_vm2, %v1995_v14  ;;  %v2013_v36 = vpack.c.bf16 %v92_v34, %v90_v33  ;;  %v89_v37 = vld [vmem:[#allocation8 + $0xc0] sm:$0xff]  ;;  %v94_v39 = vld [vmem:[#allocation8 + $0xf8] sm:$0xff]  ;;  %v96_v40 = vld [vmem:[#allocation8 + $0x110] sm:$0xff] }
  0x53   :  { %1998 = vmatprep.subr.bf16.mxu0 %v2550_v1  ;;  %v2015_v41 = vpack.c.bf16 %v91_v38, %v89_v37  ;;  %v2017_v42 = vpack.c.bf16 %v96_v40, %v94_v39  ;;  %v93_v43 = vld [vmem:[#allocation8 + $0xf0] sm:$0xff]  ;;  %v95_v44 = vld [vmem:[#allocation8 + $0x108] sm:$0xff]  ;;  %v100_v46 = vld [vmem:[#allocation8 + $0x140] sm:$0xff]  ;;  %p2521_p8 = pnand %p2520_p7, %p2514_p4 }
  0x54   :  { %v98_v45 = vld [vmem:[#allocation8 + $0x128] sm:$0xff]  ;;  %v2019_v47 = vpack.c.bf16 %v95_v44, %v93_v43  ;;  %v97_v49 = vld [vmem:[#allocation8 + $0x120] sm:$0xff]  ;;  %v99_v50 = vld [vmem:[#allocation8 + $0x138] sm:$0xff] }
  0x55   :  { %1672 = vmatmul.mubr.msk.f32.vlgmr.msra.gmra.mrb[0].mxu0 %vm285_vm3, %v268_v17  ;;  %v2021_v48 = vpack.c.bf16 %v100_v46, %v98_v45  ;;  %v102_v51 = vld [vmem:[#allocation8 + $0x158] sm:$0xff]  ;;  %v104_v52 = vld [vmem:[#allocation8 + $0x170] sm:$0xff]  ;;  %v2023_v53 = vpack.c.bf16 %v99_v50, %v97_v49  ;;  %v103_v56 = vld [vmem:[#allocation8 + $0x168] sm:$0xff] }
  0x56   :  { %2000 = vmatpush3.bf16.msra.mxu0 %v1999_v18  ;;  %1793 = vmatprep.mubr.msk.f32.mxu0 %vm2552_vm4, %v2549_v0  ;;  %v2025_v54 = vpack.c.bf16 %v104_v52, %v102_v51  ;;  %v101_v55 = vld [vmem:[#allocation8 + $0x150] sm:$0xff]  ;;  %v106_v57 = vld [vmem:[#allocation8 + $0x188] sm:$0xff]  ;;  %v108_v58 = vld [vmem:[#allocation8 + $0x1a0] sm:$0xff] }
  0x57   :  { %2001 = vmatprep.subr.bf16.mxu0 %v2550_v1  ;;  %v2027_v59 = vpack.c.bf16 %v103_v56, %v101_v55  ;;  %v2029_v60 = vpack.c.bf16 %v108_v58, %v106_v57  ;;  %v105_v61 = vld [vmem:[#allocation8 + $0x180] sm:$0xff]  ;;  %v107_v62 = vld [vmem:[#allocation8 + $0x198] sm:$0xff]  ;;  %v112_v2 = vld [vmem:[#allocation8 + $0x1d0] sm:$0xff] }
  0x58   :  { %v110_v63 = vld [vmem:[#allocation8 + $0x1b8] sm:$0xff]  ;;  %v2031_v3 = vpack.c.bf16 %v107_v62, %v105_v61  ;;  %v109_v5 = vld [vmem:[#allocation8 + $0x1b0] sm:$0xff]  ;;  %v111_v6 = vld [vmem:[#allocation8 + $0x1c8] sm:$0xff] }
  0x59   :  { %v2033_v4 = vpack.c.bf16 %v112_v2, %v110_v63  ;;  %v114_v7 = vld [vmem:[#allocation8 + $0x1e8] sm:$0xff]  ;;  %v116_v8 = vld [vmem:[#allocation8 + $0x200] sm:$0xff]  ;;  %v2035_v9 = vpack.c.bf16 %v111_v6, %v109_v5  ;;  %v115_v12 = vld [vmem:[#allocation8 + $0x1f8] sm:$0xff] }
  0x5a   :  { %2004 = vmatpush3.bf16.msk.msra.mxu0 %vm2639_vm2, %v2002_v23  ;;  %v2037_v10 = vpack.c.bf16 %v116_v8, %v114_v7  ;;  %v113_v11 = vld [vmem:[#allocation8 + $0x1e0] sm:$0xff]  ;;  %v118_v13 = vld [vmem:[#allocation8 + $0x218] sm:$0xff]  ;;  %v120_v14 = vld [vmem:[#allocation8 + $0x230] sm:$0xff] }
  0x5b   :  { %2006 = vmatprep.subr.bf16.mxu0 %v2005_v24  ;;  %v2039_v15 = vpack.c.bf16 %v115_v12, %v113_v11  ;;  %v2041_v16 = vpack.c.bf16 %v120_v14, %v118_v13  ;;  %v119_v18 = vld [vmem:[#allocation8 + $0x228] sm:$0xff]  ;;  %v124_v20 = vld [vmem:[#allocation8 + $0x260] sm:$0xff]  ;;  %v123_v24 = vld [vmem:[#allocation8 + $0x258] sm:$0xff] }
  0x5c   :  { %v122_v19 = vld [vmem:[#allocation8 + $0x248] sm:$0xff]  ;;  %v121_v23 = vld [vmem:[#allocation8 + $0x240] sm:$0xff]  ;;  %v126_v25 = vld [vmem:[#allocation8 + $0x278] sm:$0xff] }
  0x5d   :  { %1794 = vmatmul.mubr.msk.f32.vlgmr.msra.gmra.mrb[2].mxu0 %vm285_vm3, %v268_v17  ;;  %v117_v17 = vld [vmem:[#allocation8 + $0x210] sm:$0xff]  ;;  %v2045_v22 = vpack.c.bf16 %v124_v20, %v122_v19  ;;  %v2047_v27 = vpack.c.bf16 %v123_v24, %v121_v23  ;;  %v130_v31 = vld [vmem:[#allocation8 + $0x2a8] sm:$0xff]  ;;  %v132_v32 = vld [vmem:[#allocation8 + $0x2c0] sm:$0xff] }
  0x5e   :  { %2008 = vmatpush1.bf16.msra.mxu0 %v2007_v29  ;;  %v2043_v21 = vpack.c.bf16 %v119_v18, %v117_v17  ;;  %v128_v26 = vld [vmem:[#allocation8 + $0x290] sm:$0xff]  ;;  %v2053_v34 = vpack.c.bf16 %v132_v32, %v130_v31  ;;  %v134_v37 = vld [vmem:[#allocation8 + $0x2d8] sm:$0xff]  ;;  %v138_v43 = vld [vmem:[#allocation8 + $0x308] sm:$0xff] }
  0x5f   :  { %2010 = vmatprep.subr.bf16.mxu0 %v2009_v30  ;;  %v2049_v28 = vpack.c.bf16 %v128_v26, %v126_v25  ;;  %v125_v29 = vld [vmem:[#allocation8 + $0x270] sm:$0xff]  ;;  %v127_v30 = vld [vmem:[#allocation8 + $0x288] sm:$0xff]  ;;  %v140_v44 = vld [vmem:[#allocation8 + $0x320] sm:$0xff] }
  0x60   :  { %v2051_v33 = vpack.c.bf16 %v127_v30, %v125_v29  ;;  %v136_v38 = vld [vmem:[#allocation8 + $0x2f0] sm:$0xff]  ;;  %v2061_v46 = vpack.c.bf16 %v140_v44, %v138_v43  ;;  %v142_v50 = vld [vmem:[#allocation8 + $0x338] sm:$0xff]  ;;  %v146_v56 = vld [vmem:[#allocation8 + $0x368] sm:$0xff] }
  0x61   :  { %v2057_v40 = vpack.c.bf16 %v136_v38, %v134_v37  ;;  %v144_v51 = vld [vmem:[#allocation8 + $0x350] sm:$0xff]  ;;  %v148_v57 = vld [vmem:[#allocation8 + $0x380] sm:$0xff]  ;;  %v162_v63 = vld [vmem:[#allocation8 + $0x438] sm:$0xff] }
  0x62   :  { %2012 = vmatpush1.bf16.msra.mxu0 %v2011_v35  ;;  %v129_v35 = vld [vmem:[#allocation8 + $0x2a0] sm:$0xff]  ;;  %v2065_v52 = vpack.c.bf16 %v144_v51, %v142_v50  ;;  %v2069_v58 = vpack.c.bf16 %v148_v57, %v146_v56  ;;  %v166_v7 = vld [vmem:[#allocation8 + $0x498] sm:$0xff]  ;;  %v154_v43 = vld [vmem:[#allocation8 + $0x3c8] sm:$0xff] }
  0x63   :  { %2014 = vmatprep.subr.bf16.mxu0 %v2013_v36  ;;  %v131_v36 = vld [vmem:[#allocation8 + $0x2b8] sm:$0xff]  ;;  %v161_v61 = vld [vmem:[#allocation8 + $0x420] sm:$0xff]  ;;  %vm2078_vm6 = vmpackc.low %vm458_vm5, %vm2551_vm1 }
  0x64   :  { %v2055_v39 = vpack.c.bf16 %v131_v36, %v129_v35  ;;  %v2087_v2 = vpack.c.bf16 %v162_v63, %v161_v61  ;;  %v165_v6 = vld [vmem:[#allocation8 + $0x480] sm:$0xff]  ;;  %v170_v13 = vld [vmem:[#allocation8 + $0x4f8] sm:$0xff]  ;;  %v152_v35 = vld [vmem:[#allocation8 + $0x3b0] sm:$0xff] }
  0x65   :  { %v2093_v8 = vpack.c.bf16 %v166_v7, %v165_v6  ;;  %v169_v12 = vld [vmem:[#allocation8 + $0x4e0] sm:$0xff]  ;;  %v174_v19 = vld [vmem:[#allocation8 + $0x558] sm:$0xff]  ;;  %v176_v56 = vld [vmem:[#allocation8 + $0x588] sm:$0xff] }
  0x66   :  { %2016 = vmatpush1.bf16.msra.mxu0 %v2015_v41  ;;  %v133_v41 = vld [vmem:[#allocation8 + $0x2d0] sm:$0xff]  ;;  %v2099_v14 = vpack.c.bf16 %v170_v13, %v169_v12  ;;  %v173_v18 = vld [vmem:[#allocation8 + $0x540] sm:$0xff]  ;;  %v147_v32 = vld [vmem:[#allocation8 + $0x378] sm:$0xff] }
  0x67   :  { %2018 = vmatprep.subr.bf16.mxu0 %v2017_v42  ;;  %v135_v42 = vld [vmem:[#allocation8 + $0x2e8] sm:$0xff]  ;;  %v2105_v20 = vpack.c.bf16 %v174_v19, %v173_v18  ;;  %v145_v31 = vld [vmem:[#allocation8 + $0x360] sm:$0xff]  ;;  %v155_v51 = vld [vmem:[#allocation8 + $0x3d8] sm:$0xf] }
  0x68   :  { %v2059_v45 = vpack.c.bf16 %v135_v42, %v133_v41  ;;  %v80_v24 = vld [vmem:[#allocation8 + $0x960] ss:$8 sm:$0x7]  ;;  %v2071_v38 = vpack.c.bf16 %v147_v32, %v145_v31  ;;  %v179_v31 = vld [vmem:[#allocation8 + $0x5b8] sm:$0xff] }
  0x69   :  { %v149_v41 = vld [vmem:[#allocation8 + $0x390] sm:$0xff]  ;;  %v151_v42 = vld [vmem:[#allocation8 + $0x3a8] sm:$0xff]  ;;  %v156_v44 = vld [vmem:[#allocation8 + $0x3e0] sm:$0xf] }
  0x6a   :  { %2020 = vmatpush1.bf16.msra.mxu0 %v2019_v47  ;;  %v137_v47 = vld [vmem:[#allocation8 + $0x300] sm:$0xff]  ;;  %v207_v63 = vld [vmem:[#allocation8 + $0x688] sm:$0xff]  ;;  %v216_v6 = vld [vmem:[#allocation8 + $0x6d0] sm:$0xff] }
  0x6b   :  { %2022 = vmatprep.subr.bf16.mxu0 %v2021_v48  ;;  %v139_v48 = vld [vmem:[#allocation8 + $0x318] sm:$0xff]  ;;  %v153_v50 = vld [vmem:[#allocation8 + $0x3c0] sm:$0xff]  ;;  %v219_v7 = vld [vmem:[#allocation8 + $0x6e8] sm:$0xff] }
  0x6c   :  { %v2063_v49 = vpack.c.bf16 %v139_v48, %v137_v47  ;;  %v228_v12 = vld [vmem:[#allocation8 + $0x730] sm:$0xff]  ;;  %v231_v13 = vld [vmem:[#allocation8 + $0x748] sm:$0xff] }
  0x6d   :  { %v240_v18 = vld [vmem:[#allocation8 + $0x790] sm:$0xff]  ;;  %v243_v19 = vld [vmem:[#allocation8 + $0x7a8] sm:$0xff] }
  0x6e   :  { %2024 = vmatpush1.bf16.msra.mxu0 %v2023_v53  ;;  %v141_v53 = vld [vmem:[#allocation8 + $0x330] sm:$0xff] }
  0x6f   :  { %2026 = vmatprep.subr.bf16.mxu0 %v2025_v54  ;;  %v143_v54 = vld [vmem:[#allocation8 + $0x348] sm:$0xff]  ;;  %v182_v32 = vld [vmem:[#allocation8 + $0x5d0] sm:$0xff] }
  0x70   :  { %v2067_v55 = vpack.c.bf16 %v143_v54, %v141_v53  ;;  %v2080_v53 = vpack.c.bf16 %v155_v51, %v153_v50  ;;  %v198_v50 = vld [vmem:[#allocation8 + $0x650] sm:$0x3]  ;;  %v181_v51 = vld [vmem:[#allocation8 + $0x5c8] sm:$0xff] }
  0x72   :  { %2028 = vmatpush1.bf16.msra.mxu0 %v2027_v59  ;;  %v159_v59 = vld [vmem:[#allocation8 + $0x3f0] sm:$0xff] }
  0x73   :  { %2030 = vmatprep.subr.bf16.mxu0 %v2029_v60  ;;  %v160_v60 = vld [vmem:[#allocation8 + $0x408] sm:$0xff] }
  0x74   :  { %v2084_v62 = vpack.c.bf16 %v160_v60, %v159_v59  ;;  %v180_v59 = vld [vmem:[#allocation8 + $0x5c0] sm:$0xff]  ;;  %v183_v60 = vld [vmem:[#allocation8 + $0x5d8] sm:$0xff] }
  0x75   :  { %v2110_v61 = vpack.c.bf16 %v183_v60, %v180_v59  ;;  %v193_v59 = vld [vmem:[#allocation8 + $0x628] sm:$0xff]  ;;  %v196_v60 = vld [vmem:[#allocation8 + $0x640] sm:$0xff] }
  0x76   :  { %2032 = vmatpush1.bf16.msra.mxu0 %v2031_v3  ;;  %2085 = vmatpush1.bf16.msra.mxu1 %v2084_v62  ;;  %v163_v3 = vld [vmem:[#allocation8 + $0x450] sm:$0xff] }
  0x77   :  { %2034 = vmatprep.subr.bf16.mxu0 %v2033_v4  ;;  %2086 = vmatprep.subr.bf16.mxu1 %v2550_v1  ;;  %v164_v4 = vld [vmem:[#allocation8 + $0x468] sm:$0xff]  ;;  %v204_v62 = vld [vmem:[#allocation8 + $0x670] sm:$0xff] }
  0x78   :  { %v2090_v5 = vpack.c.bf16 %v164_v4, %v163_v3  ;;  %v210_v3 = vld [vmem:[#allocation8 + $0x6a0] sm:$0xff]  ;;  %v213_v4 = vld [vmem:[#allocation8 + $0x6b8] sm:$0xff] }
  0x7a   :  { %2036 = vmatpush1.bf16.msra.mxu0 %v2035_v9  ;;  %2088 = vmatpush1.bf16.msra.mxu1 %v2087_v2  ;;  %v167_v9 = vld [vmem:[#allocation8 + $0x4b0] sm:$0xff]  ;;  %v2684_v2 = vpack.c.bf16 %v207_v63, %v204_v62  ;;  %v203_v62 = vld [vmem:[#allocation8 + $0x668] sm:$0xff]  ;;  %v206_v63 = vld [vmem:[#allocation8 + $0x680] sm:$0xff] }
  0x7b   :  { %2038 = vmatprep.subr.bf16.mxu0 %v2037_v10  ;;  %2089 = vmatprep.subr.bf16.mxu1 %v2550_v1  ;;  %v168_v10 = vld [vmem:[#allocation8 + $0x4c8] sm:$0xff] }
  0x7c   :  { %v2096_v11 = vpack.c.bf16 %v168_v10, %v167_v9  ;;  %v222_v9 = vld [vmem:[#allocation8 + $0x700] sm:$0xff]  ;;  %v225_v10 = vld [vmem:[#allocation8 + $0x718] sm:$0xff] }
  0x7e   :  { %2040 = vmatpush1.bf16.msra.mxu0 %v2039_v15  ;;  %2091 = vmatpush1.bf16.msra.mxu1 %v2090_v5  ;;  %v171_v15 = vld [vmem:[#allocation8 + $0x510] sm:$0xff]  ;;  %v2688_v5 = vpack.c.bf16 %v213_v4, %v210_v3  ;;  %v202_v3 = vld [vmem:[#allocation8 + $0x660] sm:$0xff]  ;;  %v205_v4 = vld [vmem:[#allocation8 + $0x678] sm:$0xff] }
  0x7f   :  { %2042 = vmatprep.subr.bf16.mxu0 %v2041_v16  ;;  %2092 = vmatprep.subr.bf16.mxu1 %v2550_v1  ;;  %v172_v16 = vld [vmem:[#allocation8 + $0x528] sm:$0xff] }
  0x80   :  { %v2102_v17 = vpack.c.bf16 %v172_v16, %v171_v15  ;;  %v234_v15 = vld [vmem:[#allocation8 + $0x760] sm:$0xff]  ;;  %v237_v16 = vld [vmem:[#allocation8 + $0x778] sm:$0xff] }
  0x82   :  { %2044 = vmatpush1.bf16.msra.mxu0 %v2043_v21  ;;  %2094 = vmatpush1.bf16.msra.mxu1 %v2093_v8  ;;  %v270_v21 = vlaneseq  ;;  %v2692_v8 = vpack.c.bf16 %v219_v7, %v216_v6  ;;  %v209_v6 = vld [vmem:[#allocation8 + $0x698] sm:$0xff]  ;;  %v212_v7 = vld [vmem:[#allocation8 + $0x6b0] sm:$0xff] }
  0x83   :  { %2046 = vmatprep.subr.bf16.mxu0 %v2045_v22  ;;  %2095 = vmatprep.subr.bf16.mxu1 %v2550_v1 }
  0x84   :  { %v2664_v22 = vshrl.u32 %v270_v21, 7 }
  0x86   :  { %2048 = vmatpush1.bf16.msra.mxu0 %v2047_v27  ;;  %2097 = vmatpush1.bf16.msra.mxu1 %v2096_v11  ;;  %v2667_v23 = vsub.s32 0, %v2664_v22  ;;  %v2670_v25 = vsub.s32 1, %v2664_v22  ;;  %v280_v36 = vsub.s32 2, %v2664_v22  ;;  %v2696_v11 = vpack.c.bf16 %v225_v10, %v222_v9  ;;  %v199_v9 = vld [vmem:[#allocation8 + $0x658] sm:$0x3] }
  0x87   :  { %2050 = vmatprep.subr.bf16.mxu0 %v2049_v28  ;;  %2098 = vmatprep.subr.bf16.mxu1 %v2550_v1  ;;  %v2724_v10 = vpack.c.bf16 %v206_v63, %v203_v62  ;;  %v249_v62 = vld [vmem:[#allocation8 + $0x7d8] sm:$0xff] }
  0x88   :  { %v273_v26 = vrot.slane %v80_v24, %v2667_v23  ;;  %v277_v27 = vrot.slane %v80_v24, %v2670_v25 }
  0x8a   :  { %2052 = vmatpush1.bf16.msra.mxu0 %v2051_v33  ;;  %2100 = vmatpush1.bf16.msra.mxu1 %v2099_v14  ;;  %v2700_v14 = vpack.c.bf16 %v231_v13, %v228_v12  ;;  %v2726_v12 = vpack.c.bf16 %v205_v4, %v202_v3  ;;  %v2728_v13 = vpack.c.bf16 %v212_v7, %v209_v6  ;;  %v178_v3 = vld [vmem:[#allocation8 + $0x962] ss:$0 sm:$0xff]  ;;  %v687_v4 = vand.u32 127, %v270_v21 }
  0x8b   :  { %2054 = vmatprep.subr.bf16.mxu0 %v2053_v34  ;;  %2101 = vmatprep.subr.bf16.mxu1 %v2550_v1  ;;  %v150_v34 = vld [vmem:[#allocation8 + $0x398] sm:$0xff] }
  0x8c   :  { %vm688_vm11 = vcmp.lt.s32.totalorder %v687_v4, 50  ;;  %vm691_vm12 = vcmp.eq.s32.totalorder %v687_v4, 50 }
  0x8e   :  { %2056 = vmatpush1.bf16.msra.mxu0 %v2055_v39  ;;  %2103 = vmatpush1.bf16.msra.mxu1 %v2102_v17  ;;  %v2704_v17 = vpack.c.bf16 %v237_v16, %v234_v15  ;;  %v208_v15 = vld [vmem:[#allocation8 + $0x690] sm:$0xff]  ;;  %v211_v16 = vld [vmem:[#allocation8 + $0x6a8] sm:$0xff] }
  0x8f   :  { %2058 = vmatprep.subr.bf16.mxu0 %v2057_v40  ;;  %2104 = vmatprep.subr.bf16.mxu1 %v2550_v1  ;;  %v2073_v40 = vpack.c.bf16 %v152_v35, %v150_v34  ;;  %v186_v34 = vld [vmem:[#allocation8 + $0x5f0] sm:$0xff]  ;;  %v189_v35 = vld [vmem:[#allocation8 + $0x608] sm:$0xff] }
  0x92   :  { %2060 = vmatpush1.bf16.msra.mxu0 %v2059_v45  ;;  %2106 = vmatpush1.bf16.msra.mxu1 %v2105_v20  ;;  %v281_v45 = vrot.slane %v80_v24, %v280_v36  ;;  %v2708_v20 = vpack.c.bf16 %v243_v19, %v240_v18  ;;  %v158_v24 = vld [vmem:[#allocation8 + $0x961] ss:$8 sm:$0x3] }
  0x93   :  { %2062 = vmatprep.subr.bf16.mxu0 %v2061_v46  ;;  %2107 = vmatprep.subr.bf16.mxu1 %v2550_v1  ;;  %v2075_v46 = vpack.c.bf16 %v151_v42, %v149_v41  ;;  %v185_v41 = vld [vmem:[#allocation8 + $0x5e8] sm:$0xff]  ;;  %v188_v42 = vld [vmem:[#allocation8 + $0x600] sm:$0xff] }
  0x94   :  { %v215_v18 = vld [vmem:[#allocation8 + $0x6c8] sm:$0xff]  ;;  %v218_v19 = vld [vmem:[#allocation8 + $0x6e0] sm:$0xff] }
  0x96   :  { %2064 = vmatpush1.bf16.msra.mxu0 %v2063_v49  ;;  %v2077_v49 = vpack.c.bf16 %v156_v44, %v154_v43  ;;  %v192_v43 = vld [vmem:[#allocation8 + $0x620] sm:$0xff]  ;;  %v195_v44 = vld [vmem:[#allocation8 + $0x638] sm:$0xff] }
  0x97   :  { %2066 = vmatprep.subr.bf16.mxu0 %v2065_v52 }
  0x9a   :  { %2068 = vmatpush1.bf16.msra.mxu0 %v2067_v55  ;;  %v175_v55 = vld [vmem:[#allocation8 + $0x570] sm:$0xff] }
  0x9b   :  { %2070 = vmatprep.subr.bf16.mxu0 %v2069_v58  ;;  %v2108_v57 = vpack.c.bf16 %v176_v56, %v175_v55  ;;  %v177_v58 = vld [vmem:[#allocation8 + $0x5a0] sm:$0x3f]  ;;  %v187_v56 = vld [vmem:[#allocation8 + $0x5f8] sm:$0xff] }
  0x9d   :  { %2109 = vmatpush1.bf16.msra.mxu1 %v2108_v57  ;;  %v190_v57 = vld [vmem:[#allocation8 + $0x610] sm:$0xff] }
  0x9e   :  { %652 = vmatprep.subr.mxu1 %v2549_v0 }
  0xa1   :  { %1678 = vmatpush1.msk.msra.mxu1 %vm289_vm0, %v177_v58  ;;  %v2126_v58 = vpack.c.bf16 %v190_v57, %v187_v56  ;;  %v248_v56 = vld [vmem:[#allocation8 + $0x7d0] sm:$0xff] }
  0xa2   :  { %2111 = vmatprep.subr.bf16.mxu1 %v2110_v61  ;;  %v2129_v61 = vpack.c.bf16 %v196_v60, %v193_v59  ;;  %v247_v59 = vld [vmem:[#allocation8 + $0x7c8] sm:$0xff]  ;;  %v246_v60 = vld [vmem:[#allocation8 + $0x7c0] sm:$0xff] }
  0xa3   :  { %v2774_v63 = vpack.c.bf16 %v249_v62, %v246_v60 }
 0x128   :  { %v365_v28 = vpop.f32.mrb[0].mxu0 }
 0x129   :  { %v366_v29 = vadd.f32 %v365_v28, %v273_v26  ;;  %v367_v30 = vpop.f32.mrb[1].mxu0  ;;  %v447_v26 = vrot.slane %v158_v24, %v2667_v23 }
 0x12a   :  { %v368_v33 = vadd.f32 %v367_v30, %v277_v27  ;;  %v451_v27 = vrot.slane %v158_v24, %v2670_v25  ;;  %v2734_v24 = vpack.c.bf16 %v211_v16, %v208_v15 }
 0x12b   :  { %v440_v39 = vmax.f32 %v366_v29, 0.0 }
 0x12c   :  { %v441_v37 = vmax.f32 %v368_v33, 0.0 }
 0x12e   :  { %529 = vmatprep.mubr.f32.mxu0 %v441_v37 }
 0x12f   :  { %530 = vmatmul.mubr.f32.vlgmr.msra.gmra.mrb[4].mxu0 %v440_v39 }
 0x130   :  { %2072 = vmatpush1.bf16.msra.mxu0 %v2071_v38  ;;  %v436_v47 = vpop.f32.mrb[2].mxu0  ;;  %600 = vmatprep.mubr.f32.mxu0 %v2549_v0  ;;  %v2112_v38 = vpack.c.bf16 %v182_v32, %v179_v31 }
 0x131   :  { %2074 = vmatprep.subr.bf16.mxu0 %v2073_v40  ;;  %v1795_v48 = vpop.f32.mrb[3].mxu0  ;;  %v437_v52 = vadd.f32 %v436_v47, %v281_v45  ;;  %v2114_v40 = vpack.c.bf16 %v189_v35, %v186_v34  ;;  %v2116_v45 = vpack.c.bf16 %v188_v42, %v185_v41  ;;  %v191_v47 = vld [vmem:[#allocation8 + $0x618] sm:$0xff]  ;;  %v223_v34 = vld [vmem:[#allocation8 + $0x708] sm:$0xff] }
 0x132   :  { %v194_v48 = vld [vmem:[#allocation8 + $0x630] sm:$0xff]  ;;  %v227_v35 = vld [vmem:[#allocation8 + $0x728] sm:$0xff]  ;;  %v229_v41 = vld [vmem:[#allocation8 + $0x738] sm:$0xff] }
 0x133   :  { %v442_v54 = vmax.f32 %v437_v52, 0.0  ;;  %v184_v52 = vld [vmem:[#allocation8 + $0x5e0] sm:$0xff]  ;;  %v233_v42 = vld [vmem:[#allocation8 + $0x758] sm:$0xff] }
 0x134   :  { %2076 = vmatpush1.bf16.msra.mxu0 %v2075_v46  ;;  %v2118_v46 = vpack.c.bf16 %v195_v44, %v192_v43  ;;  %v2123_v55 = vpack.c.bf16 %v184_v52, %v181_v51  ;;  %v236_v43 = vld [vmem:[#allocation8 + $0x770] sm:$0xff]  ;;  %v238_v52 = vld [vmem:[#allocation8 + $0x780] sm:$0xff] }
 0x135   :  { %2079 = vmatprep.subr.msk.bf16.mxu0 %vm2078_vm6, %v2077_v49  ;;  %v2120_v49 = vpack.c.bf16 %v194_v48, %v191_v47  ;;  %v235_v47 = vld [vmem:[#allocation8 + $0x768] sm:$0xff] }
 0x136   :  { %v239_v48 = vld [vmem:[#allocation8 + $0x788] sm:$0xff] }
 0x138   :  { %2082 = vmatpush1.bf16.msk.msra.mxu0 %vm2078_vm6, %v2080_v53  ;;  %v197_v53 = vld [vmem:[#allocation8 + $0x648] sm:$0x3] }
 0x139   :  { %2163 = vmatprep.subr.bf16.mxu0 %v2550_v1 }
 0x13b   :  { %1677 = vmatmul.mubr.msk.f32.vlgmr.msra.gmra.mrb[4].mxu0 %vm454_vm7, %v442_v54  ;;  %v695_v54 = vld [vmem:[#allocation5] sm:$0xff] }
 0x13c   :  { %1845 = vmatprep.mubr.msk.f32.mxu0 %vm2552_vm4, %v2549_v0  ;;  %2165 = vmatpush3.bf16.msra.mxu0 %v2684_v2 }
 0x13d   :  { %2166 = vmatprep.subr.bf16.mxu0 %v2550_v1 }
 0x140   :  { %2168 = vmatpush3.bf16.msra.mxu0 %v2688_v5 }
 0x141   :  { %2169 = vmatprep.subr.bf16.mxu0 %v2550_v1 }
 0x144   :  { %2171 = vmatpush3.bf16.msra.mxu0 %v2692_v8 }
 0x145   :  { %2172 = vmatprep.subr.bf16.mxu0 %v2550_v1 }
 0x148   :  { %2174 = vmatpush3.bf16.msra.mxu0 %v2696_v11 }
 0x149   :  { %2175 = vmatprep.subr.bf16.mxu0 %v2550_v1 }
 0x14c   :  { %2177 = vmatpush3.bf16.msra.mxu0 %v2700_v14 }
 0x14d   :  { %2178 = vmatprep.subr.bf16.mxu0 %v2550_v1 }
 0x150   :  { %2180 = vmatpush3.bf16.msra.mxu0 %v2704_v17 }
 0x151   :  { %2181 = vmatprep.subr.bf16.mxu0 %v2550_v1 }
 0x154   :  { %2183 = vmatpush3.bf16.msra.mxu0 %v2708_v20 }
 0x155   :  { %2184 = vmatprep.subr.bf16.mxu0 %v2550_v1 }
 0x158   :  { %2186 = vmatpush3.bf16.msra.mxu0 %v2774_v63 }
 0x159   :  { %2219 = vmatprep.subr.bf16.mxu0 %v2550_v1 }
 0x20e   :  { %v602_v28 = vpop.f32.mrb[4].mxu0 }
 0x20f   :  { %v2379_v29 = vadd.f32 %v602_v28, %v447_v26  ;;  %v604_v30 = vpop.f32.mrb[5].mxu0  ;;  %v2738_v26 = vpack.c.bf16 %v218_v19, %v215_v18  ;;  %v217_v28 = vld [vmem:[#allocation8 + $0x6d8] sm:$0xff] }
 0x210   :  { %v2380_v33 = vadd.f32 %v604_v30, %v451_v27  ;;  %v214_v27 = vld [vmem:[#allocation8 + $0x6c0] sm:$0xff]  ;;  %v224_v30 = vld [vmem:[#allocation8 + $0x710] sm:$0xff] }
 0x211   :  { %v607_v39 = vmax.f32 %v2379_v29, 0.0  ;;  %v221_v29 = vld [vmem:[#allocation8 + $0x6f8] sm:$0xff]  ;;  %v2741_v31 = vpack.c.bf16 %v217_v28, %v214_v27 }
 0x212   :  { %v608_v37 = vmax.f32 %v2380_v33, 0.0  ;;  %v2744_v32 = vpack.c.bf16 %v224_v30, %v221_v29  ;;  %v220_v33 = vld [vmem:[#allocation8 + $0x6f0] sm:$0xff] }
 0x214   :  { %1679 = vmatprep.mubr.msk.f32.mxu1 %vm609_vm8, %v608_v37  ;;  %v230_v37 = vld [vmem:[#allocation8 + $0x740] sm:$0xff] }
 0x215   :  { %681 = vmatmul.mubr.f32.vlgmr.msra.gmra.mrb[0].mxu1 %v607_v39  ;;  %v2750_v39 = vpack.c.bf16 %v230_v37, %v227_v35 }
 0x216   :  { %2113 = vmatpush1.bf16.msra.mxu1 %v2112_v38  ;;  %790 = vmatprep.mubr.f32.mxu1 %v2549_v0  ;;  %v2747_v38 = vpack.c.bf16 %v223_v34, %v220_v33  ;;  %v201_v33 = vld [vmem:[#allocation8 + $0x963] ss:$8 sm:$0x7] }
 0x217   :  { %2115 = vmatprep.subr.bf16.mxu1 %v2114_v40  ;;  %v226_v40 = vld [vmem:[#allocation8 + $0x720] sm:$0xff]  ;;  %v700_v34 = vrot.slane %v201_v33, %v2667_v23  ;;  %v708_v23 = vrot.slane %v201_v33, %v280_v36 }
 0x218   :  { %v2753_v44 = vpack.c.bf16 %v229_v41, %v226_v40 }
 0x21a   :  { %2117 = vmatpush1.bf16.msra.mxu1 %v2116_v45  ;;  %v2756_v45 = vpack.c.bf16 %v236_v43, %v233_v42 }
 0x21b   :  { %2119 = vmatprep.subr.bf16.mxu1 %v2118_v46  ;;  %v232_v46 = vld [vmem:[#allocation8 + $0x750] sm:$0xff] }
 0x21e   :  { %2121 = vmatpush1.bf16.msra.mxu1 %v2120_v49  ;;  %v242_v49 = vld [vmem:[#allocation8 + $0x7a0] sm:$0xff] }
 0x21f   :  { %1680 = vmatprep.subr.msk.mxu1 %vm716_vm9, %v198_v50  ;;  %v2759_v50 = vpack.c.bf16 %v235_v47, %v232_v46  ;;  %v2762_v51 = vpack.c.bf16 %v242_v49, %v239_v48  ;;  %v704_v47 = vrot.slane %v201_v33, %v2670_v25 }
 0x222   :  { %1681 = vmatpush1.msk.msra.mxu1 %vm716_vm9, %v197_v53  ;;  %v241_v53 = vld [vmem:[#allocation8 + $0x798] sm:$0xff] }
 0x223   :  { %1682 = vmatmul.mubr.msk.f32.vlgmr.msra.gmra.mrb[2].mxu1 %vm712_vm10, %v695_v54  ;;  %2122 = vmatprep.subr.bf16.mxu1 %v2550_v1 }
 0x224   :  { %2124 = vmatpush3.bf16.msra.mxu1 %v2123_v55  ;;  %1810 = vmatprep.mubr.msk.f32.mxu1 %vm2552_vm4, %v2549_v0  ;;  %v245_v55 = vld [vmem:[#allocation8 + $0x7b8] sm:$0xff] }
 0x225   :  { %2125 = vmatprep.subr.bf16.mxu1 %v2550_v1  ;;  %v2769_v57 = vpack.c.bf16 %v248_v56, %v245_v55  ;;  %v2830_v55 = vld [vmem:[#allocation8 + $0x964] ss:$0 sm:$0xff] }
 0x228   :  { %2127 = vmatpush3.bf16.msra.mxu1 %v2126_v58  ;;  %v244_v58 = vld [vmem:[#allocation8 + $0x7b0] sm:$0xff] }
 0x229   :  { %2128 = vmatprep.subr.bf16.mxu1 %v2550_v1 }
 0x22c   :  { %2130 = vmatpush3.bf16.msra.mxu1 %v2129_v61  ;;  %v2771_v61 = vpack.c.bf16 %v247_v59, %v244_v58 }
 0x22d   :  { %1808 = vmatprep.subr.mxu1 %v2549_v0 }
 0x230   :  { %1809 = vmatpush3.msk.msra.mxu1 %vm716_vm9, %v199_v9 }
 0x231   :  { %1811 = vmatmul.mubr.msk.f32.vlgmr.msra.gmra.mrb[4].mxu1 %vm712_vm10, %v695_v54  ;;  %2132 = vmatprep.subr.bf16.mxu1 %v2724_v10  ;;  %v2765_v54 = vpack.c.bf16 %v241_v53, %v238_v52 }
 0x232   :  { %2134 = vmatpush1.bf16.msra.mxu1 %v2726_v12  ;;  %931 = vmatprep.mubr.f32.mxu1 %v2549_v0 }
 0x233   :  { %2136 = vmatprep.subr.bf16.mxu1 %v2728_v13 }
 0x236   :  { %2138 = vmatpush1.bf16.msra.mxu1 %v2734_v24 }
 0x237   :  { %2140 = vmatprep.subr.bf16.mxu1 %v2738_v26 }
 0x23a   :  { %2142 = vmatpush1.bf16.msra.mxu1 %v2741_v31 }
 0x23b   :  { %2144 = vmatprep.subr.bf16.mxu1 %v2744_v32 }
 0x23e   :  { %2146 = vmatpush1.bf16.msra.mxu1 %v2747_v38 }
 0x23f   :  { %2148 = vmatprep.subr.bf16.mxu1 %v2750_v39 }
 0x242   :  { %2150 = vmatpush1.bf16.msra.mxu1 %v2753_v44 }
 0x243   :  { %2152 = vmatprep.subr.bf16.mxu1 %v2756_v45 }
 0x246   :  { %2154 = vmatpush1.bf16.msra.mxu1 %v2759_v50 }
 0x247   :  { %2156 = vmatprep.subr.bf16.mxu1 %v2762_v51 }
 0x24a   :  { %2158 = vmatpush1.bf16.msra.mxu1 %v2765_v54 }
 0x24b   :  { %2160 = vmatprep.subr.bf16.mxu1 %v2769_v57 }
 0x24e   :  { %2162 = vmatpush1.bf16.msra.mxu1 %v2771_v61 }
 0x24f   :  { %2188 = vmatprep.subr.bf16.mxu1 %v2724_v10 }
 0x2e8   :  { %v682_v6 = vpop.f32.mrb[0].mxu1 }
 0x2e9   :  { %v683_v7 = vadd.f32 %v682_v6, %v178_v3  ;;  %v684_v9 = vpop.f32.mrb[1].mxu1 }
 0x2eb   :  { %v689_v15 = vmax.f32 %v683_v7, 0.0  ;;  %2395 = vtanh.f32 %v683_v7 }
 0x2ed   :  { %1685 = vmatmul.mubr.msk.f32.vlgmr.msra.gmra.mrb[6].mxu1 %vm688_vm11, %v689_v15  ;;  %1846 = vmatmul.mubr.msk.f32.vlgmr.msra.gmra.mrb[6].mxu0 %vm688_vm11, %v689_v15  ;;  %v2795_v16 = vsel %vm688_vm11, %v689_v15, 0.0 }
 0x2ee   :  { %2190 = vmatpush1.bf16.msra.mxu1 %v2726_v12  ;;  %2221 = vmatpush3.bf16.msra.mxu0 %v2684_v2 }
 0x2ef   :  { %2192 = vmatprep.subr.bf16.mxu1 %v2728_v13  ;;  %2222 = vmatprep.subr.bf16.mxu0 %v2550_v1 }
 0x2f0   :  { %1089 = vmatprep.mubr.f32.mxu1 %v2549_v0  ;;  %1880 = vmatprep.mubr.msk.f32.mxu0 %vm2552_vm4, %v2549_v0 }
 0x2f2   :  { %2194 = vmatpush1.bf16.msra.mxu1 %v2734_v24  ;;  %2224 = vmatpush3.bf16.msra.mxu0 %v2688_v5 }
 0x2f3   :  { %2196 = vmatprep.subr.bf16.mxu1 %v2738_v26  ;;  %2225 = vmatprep.subr.bf16.mxu0 %v2550_v1 }
 0x2f5   :  { %v2396_v21 = vpop.eup %2395 }
 0x2f6   :  { %v792_v18 = vpop.f32.mrb[2].mxu1  ;;  %2198 = vmatpush1.bf16.msra.mxu1 %v2741_v31  ;;  %2227 = vmatpush3.bf16.msra.mxu0 %v2692_v8  ;;  %v693_v19 = vsel %vm691_vm12, %v2396_v21, 0.0 }
 0x2f7   :  { %v794_v27 = vpop.f32.mrb[3].mxu1  ;;  %2200 = vmatprep.subr.bf16.mxu1 %v2744_v32  ;;  %2228 = vmatprep.subr.bf16.mxu0 %v2550_v1  ;;  %v694_v28 = vadd.f32 %v693_v19, %v2795_v16  ;;  %v2823_v35 = vadd.f32 %v792_v18, %v700_v34 }
 0x2f8   :  { %v2827_v48 = vadd.f32 %v794_v27, %v704_v47 }
 0x2f9   :  { %1640 = vst [vmem:[#allocation10] sm:$0x3] %v694_v28 }
 0x2fa   :  { %2202 = vmatpush1.bf16.msra.mxu1 %v2747_v38  ;;  %2230 = vmatpush3.bf16.msra.mxu0 %v2696_v11 }
 0x2fb   :  { %2204 = vmatprep.subr.bf16.mxu1 %v2750_v39  ;;  %2231 = vmatprep.subr.bf16.mxu0 %v2550_v1 }
 0x2fe   :  { %2206 = vmatpush1.bf16.msra.mxu1 %v2753_v44  ;;  %2233 = vmatpush3.bf16.msra.mxu0 %v2700_v14 }
 0x2ff   :  { %2208 = vmatprep.subr.bf16.mxu1 %v2756_v45  ;;  %2234 = vmatprep.subr.bf16.mxu0 %v2550_v1 }
 0x302   :  { %2210 = vmatpush1.bf16.msra.mxu1 %v2759_v50  ;;  %2236 = vmatpush3.bf16.msra.mxu0 %v2704_v17 }
 0x303   :  { %2212 = vmatprep.subr.bf16.mxu1 %v2762_v51  ;;  %2237 = vmatprep.subr.bf16.mxu0 %v2550_v1 }
 0x304   :  { %v863_v29 = vpop.f32.mrb[4].mxu1 }
 0x305   :  { %v1812_v30 = vpop.f32.mrb[5].mxu1  ;;  %v2835_v60 = vadd.f32 %v863_v29, %v708_v23 }
 0x306   :  { %2214 = vmatpush1.bf16.msra.mxu1 %v2765_v54  ;;  %2239 = vmatpush3.bf16.msra.mxu0 %v2708_v20 }
 0x307   :  { %2216 = vmatprep.subr.bf16.mxu1 %v2769_v57  ;;  %2240 = vmatprep.subr.bf16.mxu0 %v2550_v1 }
 0x30a   :  { %2218 = vmatpush1.bf16.msra.mxu1 %v2771_v61  ;;  %2242 = vmatpush3.bf16.msra.mxu0 %v2774_v63 }
 0x30b   :  { %2244 = vmatprep.subr.bf16.mxu1 %v2724_v10  ;;  %2275 = vmatprep.subr.bf16.mxu0 %v2550_v1 }
 0x3c0   :  { %v933_v37 = vpop.f32.mrb[6].mxu1  ;;  %v1004_v40 = vpop.f32.mrb[6].mxu0 }
 0x3c1   :  { %v1008_v41 = vadd.f32 %v933_v37, %v2823_v35  ;;  %v935_v42 = vpop.f32.mrb[7].mxu1  ;;  %v1847_v43 = vpop.f32.mrb[7].mxu0  ;;  %v1018_v59 = vadd.f32 %v1004_v40, %v2830_v55 }
 0x3c2   :  { %v1013_v49 = vadd.f32 %v935_v42, %v2827_v48 }
 0x3c3   :  { %v1009_v46 = vmul.f32 0.5, %v1008_v41 }
 0x3c4   :  { %v1014_v52 = vmul.f32 0.5, %v1013_v49 }
 0x3c5   :  { %2397 = vtanh.f32 %v1009_v46 }
 0x3c6   :  { %2399 = vtanh.f32 %v1014_v52 }
 0x3cf   :  { %v2398_v53 = vpop.eup %2397 }
 0x3d0   :  { %v1011_v56 = vmul.f32 0.5, %v2398_v53  ;;  %v2400_v3 = vpop.eup %2399 }
 0x3d1   :  { %v1016_v4 = vmul.f32 0.5, %v2400_v3 }
 0x3d2   :  { %v1012_v58 = vadd.f32 0.5, %v1011_v56 }
 0x3d3   :  { %v1017_v7 = vadd.f32 0.5, %v1016_v4 }
 0x3d4   :  { %v1019_v25 = vmul.f32 %v1018_v59, %v1012_v58 }
 0x3d6   :  { %v1020_v62 = vadd.f32 %v1019_v25, %v2835_v60 }
 0x3d8   :  { %2401 = vtanh.f32 %v1020_v62 }
 0x3e2   :  { %v2402_v6 = vpop.eup %2401 }
 0x3e3   :  { %v1022_v9 = vsub.f32 %v2795_v16, %v2402_v6 }
 0x3e5   :  { %v1023_v15 = vmul.f32 %v1022_v9, %v1017_v7  ;;  %v251_v9 = vld [vmem:[#allocation8 + $0x7e0] sm:$0xff] }
 0x3e7   :  { %v1024_v21 = vadd.f32 %v2402_v6, %v1023_v15  ;;  %v252_v15 = vld [vmem:[#allocation8 + $0x7f8] sm:$0xff] }
 0x3e9   :  { %1090 = vmatmul.mubr.f32.vlgmr.msra.gmra.mrb[8].mxu1 %v1024_v21  ;;  %1881 = vmatmul.mubr.f32.vlgmr.msra.gmra.mrb[8].mxu0 %v1024_v21 }
 0x3ea   :  { %2246 = vmatpush1.bf16.msra.mxu1 %v2726_v12  ;;  %2277 = vmatpush3.bf16.msra.mxu0 %v2684_v2 }
 0x3eb   :  { %2248 = vmatprep.subr.bf16.mxu1 %v2728_v13  ;;  %2278 = vmatprep.subr.bf16.mxu0 %v2550_v1 }
 0x3ec   :  { %1265 = vmatprep.mubr.f32.mxu1 %v2549_v0  ;;  %1915 = vmatprep.mubr.msk.f32.mxu0 %vm2552_vm4, %v2549_v0 }
 0x3ee   :  { %2250 = vmatpush1.bf16.msra.mxu1 %v2734_v24  ;;  %2280 = vmatpush3.bf16.msra.mxu0 %v2688_v5 }
 0x3ef   :  { %2252 = vmatprep.subr.bf16.mxu1 %v2738_v26  ;;  %2281 = vmatprep.subr.bf16.mxu0 %v2550_v1 }
 0x3f2   :  { %2254 = vmatpush1.bf16.msra.mxu1 %v2741_v31  ;;  %2283 = vmatpush3.bf16.msra.mxu0 %v2692_v8 }
 0x3f3   :  { %2256 = vmatprep.subr.bf16.mxu1 %v2744_v32  ;;  %2284 = vmatprep.subr.bf16.mxu0 %v2550_v1 }
 0x3f6   :  { %2258 = vmatpush1.bf16.msra.mxu1 %v2747_v38  ;;  %2286 = vmatpush3.bf16.msra.mxu0 %v2696_v11 }
 0x3f7   :  { %2260 = vmatprep.subr.bf16.mxu1 %v2750_v39  ;;  %2287 = vmatprep.subr.bf16.mxu0 %v2550_v1 }
 0x3fa   :  { %2262 = vmatpush1.bf16.msra.mxu1 %v2753_v44  ;;  %2289 = vmatpush3.bf16.msra.mxu0 %v2700_v14 }
 0x3fb   :  { %2264 = vmatprep.subr.bf16.mxu1 %v2756_v45  ;;  %2290 = vmatprep.subr.bf16.mxu0 %v2550_v1 }
 0x3fe   :  { %2266 = vmatpush1.bf16.msra.mxu1 %v2759_v50  ;;  %2292 = vmatpush3.bf16.msra.mxu0 %v2704_v17 }
 0x3ff   :  { %2268 = vmatprep.subr.bf16.mxu1 %v2762_v51  ;;  %2293 = vmatprep.subr.bf16.mxu0 %v2550_v1 }
 0x402   :  { %2270 = vmatpush1.bf16.msra.mxu1 %v2765_v54  ;;  %2295 = vmatpush3.bf16.msra.mxu0 %v2708_v20 }
 0x403   :  { %2272 = vmatprep.subr.bf16.mxu1 %v2769_v57  ;;  %2296 = vmatprep.subr.bf16.mxu0 %v2550_v1 }
 0x406   :  { %2274 = vmatpush1.bf16.msra.mxu1 %v2771_v61  ;;  %2298 = vmatpush3.bf16.msra.mxu0 %v2774_v63 }
 0x407   :  { %2300 = vmatprep.subr.bf16.mxu1 %v2724_v10  ;;  %2331 = vmatprep.subr.bf16.mxu0 %v2550_v1 }
 0x4bc   :  { %v1091_v36 = vpop.f32.mrb[8].mxu1  ;;  %v1162_v16 = vpop.f32.mrb[8].mxu0 }
 0x4bd   :  { %v1167_v18 = vrot.slane %v1091_v36, 6  ;;  %v1093_v19 = vpop.f32.mrb[9].mxu1  ;;  %v1882_v27 = vpop.f32.mrb[9].mxu0  ;;  %v1182_v33 = vadd.f32 %v1162_v16, %v2830_v55  ;;  %v253_v36 = vld [vmem:[#allocation8 + $0x810] sm:$0xff]  ;;  %v254_v16 = vld [vmem:[#allocation8 + $0x828] sm:$0xff] }
 0x4be   :  { %v1175_v30 = vrot.slane %v1093_v19, 6  ;;  %v255_v19 = vld [vmem:[#allocation8 + $0x840] sm:$0xff]  ;;  %v256_v27 = vld [vmem:[#allocation8 + $0x858] sm:$0xff] }
 0x4bf   :  { %v1169_v28 = vadd.f32 %v1167_v18, %v2823_v35  ;;  %v1184_v10 = vrot.slane %v1182_v33, 6  ;;  %v2359_v18 = vpack.c.bf16 %v254_v16, %v253_v36  ;;  %v259_v33 = vld [vmem:[#allocation8 + $0x8a0] sm:$0xff] }
 0x4c0   :  { %v1177_v34 = vadd.f32 %v1175_v30, %v2827_v48 }
 0x4c1   :  { %v1170_v29 = vmul.f32 0.5, %v1169_v28  ;;  %v2362_v28 = vpack.c.bf16 %v256_v27, %v255_v19 }
 0x4c2   :  { %v1178_v42 = vmul.f32 0.5, %v1177_v34  ;;  %v260_v34 = vld [vmem:[#allocation8 + $0x8b8] sm:$0xff] }
 0x4c3   :  { %2403 = vtanh.f32 %v1170_v29  ;;  %v257_v29 = vld [vmem:[#allocation8 + $0x870] sm:$0xff] }
 0x4c4   :  { %2405 = vtanh.f32 %v1178_v42  ;;  %v263_v42 = vld [vmem:[#allocation8 + $0x900] sm:$0xff] }
 0x4cd   :  { %v2404_v37 = vpop.eup %2403 }
 0x4ce   :  { %v1172_v40 = vmul.f32 0.5, %v2404_v37  ;;  %v2406_v47 = vpop.eup %2405  ;;  %v2368_v37 = vpack.c.bf16 %v260_v34, %v259_v33 }
 0x4cf   :  { %v1180_v52 = vmul.f32 0.5, %v2406_v47  ;;  %v265_v47 = vld [vmem:[#allocation8 + $0x930] sm:$0xff] }
 0x4d0   :  { %v1173_v41 = vadd.f32 0.5, %v1172_v40  ;;  %v261_v40 = vld [vmem:[#allocation8 + $0x8d0] sm:$0xff] }
 0x4d1   :  { %v1181_v56 = vadd.f32 0.5, %v1180_v52 }
 0x4d2   :  { %v1186_v43 = vmul.f32 %v1184_v10, %v1173_v41  ;;  %v262_v41 = vld [vmem:[#allocation8 + $0x8e8] sm:$0xff] }
 0x4d3   :  { %v2371_v10 = vpack.c.bf16 %v262_v41, %v261_v40 }
 0x4d4   :  { %v1187_v46 = vadd.f32 %v1186_v43, %v2835_v60  ;;  %v264_v43 = vld [vmem:[#allocation8 + $0x918] sm:$0xff] }
 0x4d6   :  { %2407 = vtanh.f32 %v1187_v46  ;;  %v2374_v46 = vpack.c.bf16 %v264_v43, %v263_v42 }
 0x4e0   :  { %v2408_v49 = vpop.eup %2407 }
 0x4e1   :  { %v1190_v53 = vrot.slane %v2408_v49, 2 }
 0x4e3   :  { %v1192_v23 = vsub.f32 %v1024_v21, %v1190_v53  ;;  %v2356_v21 = vpack.c.bf16 %v252_v15, %v251_v9 }
 0x4e5   :  { %v1194_v58 = vrot.slane %v1192_v23, 6 }
 0x4e7   :  { %v1196_v59 = vmul.f32 %v1194_v58, %v1181_v56 }
 0x4e9   :  { %v1197_v25 = vadd.f32 %v2408_v49, %v1196_v59  ;;  %v266_v49 = vld [vmem:[#allocation8 + $0x948] sm:$0xff] }
 0x4ea   :  { %v2377_v52 = vpack.c.bf16 %v266_v49, %v265_v47 }
 0x4eb   :  { %v1199_v62 = vrot.slane %v1197_v25, 2 }
 0x4ed   :  { %1266 = vmatmul.mubr.f32.vlgmr.msra.gmra.mrb[10].mxu1 %v1199_v62  ;;  %1916 = vmatmul.mubr.f32.vlgmr.msra.gmra.mrb[10].mxu0 %v1199_v62 }
 0x4ee   :  { %2302 = vmatpush1.bf16.msra.mxu1 %v2726_v12  ;;  %2333 = vmatpush3.bf16.msra.mxu0 %v2684_v2 }
 0x4ef   :  { %2304 = vmatprep.subr.bf16.mxu1 %v2728_v13  ;;  %2334 = vmatprep.subr.bf16.mxu0 %v2550_v1 }
 0x4f0   :  { %1441 = vmatprep.mubr.f32.mxu1 %v2549_v0  ;;  %1950 = vmatprep.mubr.msk.f32.mxu0 %vm2552_vm4, %v2549_v0 }
 0x4f2   :  { %2306 = vmatpush1.bf16.msra.mxu1 %v2734_v24  ;;  %2336 = vmatpush3.bf16.msra.mxu0 %v2688_v5 }
 0x4f3   :  { %2308 = vmatprep.subr.bf16.mxu1 %v2738_v26  ;;  %2337 = vmatprep.subr.bf16.mxu0 %v2550_v1 }
 0x4f6   :  { %2310 = vmatpush1.bf16.msra.mxu1 %v2741_v31  ;;  %2339 = vmatpush3.bf16.msra.mxu0 %v2692_v8 }
 0x4f7   :  { %2312 = vmatprep.subr.bf16.mxu1 %v2744_v32  ;;  %2340 = vmatprep.subr.bf16.mxu0 %v2550_v1 }
 0x4fa   :  { %2314 = vmatpush1.bf16.msra.mxu1 %v2747_v38  ;;  %2342 = vmatpush3.bf16.msra.mxu0 %v2696_v11 }
 0x4fb   :  { %2316 = vmatprep.subr.bf16.mxu1 %v2750_v39  ;;  %2343 = vmatprep.subr.bf16.mxu0 %v2550_v1 }
 0x4fe   :  { %2318 = vmatpush1.bf16.msra.mxu1 %v2753_v44  ;;  %2345 = vmatpush3.bf16.msra.mxu0 %v2700_v14 }
 0x4ff   :  { %2320 = vmatprep.subr.bf16.mxu1 %v2756_v45  ;;  %2346 = vmatprep.subr.bf16.mxu0 %v2550_v1 }
 0x502   :  { %2322 = vmatpush1.bf16.msra.mxu1 %v2759_v50  ;;  %2348 = vmatpush3.bf16.msra.mxu0 %v2704_v17 }
 0x503   :  { %2324 = vmatprep.subr.bf16.mxu1 %v2762_v51  ;;  %2349 = vmatprep.subr.bf16.mxu0 %v2550_v1 }
 0x506   :  { %2326 = vmatpush1.bf16.msra.mxu1 %v2765_v54  ;;  %2351 = vmatpush3.bf16.msra.mxu0 %v2708_v20 }
 0x507   :  { %2328 = vmatprep.subr.bf16.mxu1 %v2769_v57  ;;  %2352 = vmatprep.subr.bf16.mxu0 %v2550_v1 }
 0x50a   :  { %2330 = vmatpush1.bf16.msra.mxu1 %v2771_v61  ;;  %2354 = vmatpush3.bf16.msra.mxu0 %v2774_v63 }
 0x50b   :  { %2355 = vmatprep.subr.bf16.mxu1 %v2550_v1 }
 0x5c0   :  { %v1267_v2 = vpop.f32.mrb[10].mxu1  ;;  %v1338_v5 = vpop.f32.mrb[10].mxu0 }
 0x5c1   :  { %v1343_v8 = vrot.slane %v1267_v2, 4  ;;  %v1269_v11 = vpop.f32.mrb[11].mxu1  ;;  %v1917_v14 = vpop.f32.mrb[11].mxu0  ;;  %v1358_v13 = vadd.f32 %v1338_v5, %v2830_v55 }
 0x5c2   :  { %v1351_v20 = vrot.slane %v1269_v11, 4 }
 0x5c3   :  { %v1345_v17 = vadd.f32 %v1343_v8, %v2823_v35  ;;  %v1360_v38 = vrot.slane %v1358_v13, 4 }
 0x5c4   :  { %v1353_v24 = vadd.f32 %v1351_v20, %v2827_v48 }
 0x5c5   :  { %v1346_v12 = vmul.f32 0.5, %v1345_v17 }
 0x5c6   :  { %v1354_v39 = vmul.f32 0.5, %v1353_v24 }
 0x5c7   :  { %2409 = vtanh.f32 %v1346_v12 }
 0x5c8   :  { %2411 = vtanh.f32 %v1354_v39 }
 0x5d1   :  { %v2410_v26 = vpop.eup %2409 }
 0x5d2   :  { %v1348_v31 = vmul.f32 0.5, %v2410_v26  ;;  %v2412_v50 = vpop.eup %2411 }
 0x5d3   :  { %v1356_v54 = vmul.f32 0.5, %v2412_v50 }
 0x5d4   :  { %v1349_v32 = vadd.f32 0.5, %v1348_v31 }
 0x5d5   :  { %v1357_v63 = vadd.f32 0.5, %v1356_v54 }
 0x5d6   :  { %v1362_v44 = vmul.f32 %v1360_v38, %v1349_v32  ;;  %v2553_v32 = vmov 1983009808  }
 0x5d7   :  { %v1643_v38 = vunpack.c.l.s4 %v2553_v32 }
 0x5d8   :  { %v1363_v45 = vadd.f32 %v1362_v44, %v2835_v60 }
 0x5d9   :  { %v1644_v44 = vunpack.c.0.s8 %v1643_v38 }
 0x5da   :  { %2413 = vtanh.f32 %v1363_v45 }
 0x5e4   :  { %v2414_v51 = vpop.eup %2413 }
 0x5e5   :  { %v1366_v57 = vrot.slane %v2414_v51, 2 }
 0x5e7   :  { %v1368_v61 = vsub.f32 %v1197_v25, %v1366_v57 }
 0x5e9   :  { %v1370_v3 = vrot.slane %v1368_v61, 6 }
 0x5eb   :  { %v1372_v4 = vmul.f32 %v1370_v3, %v1357_v63  ;;  %v1623_v63 = vld [vmem:[#allocation7] sm:$0x3]  ;;  %v267_v3 = vld [vmem:[#allocation8 + $0x965] ss:$0 sm:$0xff] }
 0x5ec   :  { %vm1624_vm13 = vcmp.ne.s32.totalorder %v1623_v63, 0 }
 0x5ed   :  { %v2916_v6 = vadd.f32 %v2414_v51, %v1372_v4  ;;  %v1647_v51 = vsub.s32 %v1644_v44, %v2664_v22 }
 0x5ef   :  { %v1375_v7 = vrot.slane %v2916_v6, 4 }
 0x5f1   :  { %1442 = vmatmul.mubr.f32.vlgmr.msra.gmra.mrb[12].mxu1 %v1375_v7  ;;  %1951 = vmatmul.mubr.f32.vlgmr.msra.gmra.mrb[12].mxu0 %v1375_v7 }
 0x5f2   :  { %1985 = vmatprep.mubr.msk.f32.mxu1 %vm2552_vm4, %v2549_v0  ;;  %2357 = vmatpush3.bf16.msra.mxu1 %v2356_v21  ;;  %v258_v0 = vld [vmem:[#allocation8 + $0x888] sm:$0xff] }
 0x5f3   :  { %2358 = vmatprep.subr.bf16.mxu1 %v2550_v1  ;;  %v2365_v30 = vpack.c.bf16 %v258_v0, %v257_v29 }
 0x5f6   :  { %2360 = vmatpush3.bf16.msra.mxu1 %v2359_v18 }
 0x5f7   :  { %2361 = vmatprep.subr.bf16.mxu1 %v2550_v1 }
 0x5fa   :  { %2363 = vmatpush3.bf16.msra.mxu1 %v2362_v28 }
 0x5fb   :  { %2364 = vmatprep.subr.bf16.mxu1 %v2550_v1 }
 0x5fe   :  { %2366 = vmatpush3.bf16.msra.mxu1 %v2365_v30 }
 0x5ff   :  { %2367 = vmatprep.subr.bf16.mxu1 %v2550_v1 }
 0x602   :  { %2369 = vmatpush3.bf16.msra.mxu1 %v2368_v37 }
 0x603   :  { %2370 = vmatprep.subr.bf16.mxu1 %v2550_v1 }
 0x606   :  { %2372 = vmatpush3.bf16.msra.mxu1 %v2371_v10 }
 0x607   :  { %2373 = vmatprep.subr.bf16.mxu1 %v2550_v1 }
 0x60a   :  { %2375 = vmatpush3.bf16.msra.mxu1 %v2374_v46 }
 0x60b   :  { %2376 = vmatprep.subr.bf16.mxu1 %v2550_v1 }
 0x60e   :  { %2378 = vmatpush3.bf16.msra.mxu1 %v2377_v52 }
 0x6c4   :  { %v1443_v53 = vpop.f32.mrb[12].mxu1  ;;  %v1514_v23 = vpop.f32.mrb[12].mxu0 }
 0x6c5   :  { %v1519_v56 = vrot.slane %v1443_v53, 2  ;;  %v1445_v58 = vpop.f32.mrb[13].mxu1  ;;  %v1952_v59 = vpop.f32.mrb[13].mxu0  ;;  %v1534_v5 = vadd.f32 %v1514_v23, %v2830_v55 }
 0x6c6   :  { %v1527_v2 = vrot.slane %v1445_v58, 2 }
 0x6c7   :  { %v1521_v25 = vadd.f32 %v1519_v56, %v2823_v35  ;;  %v1536_v17 = vrot.slane %v1534_v5, 2 }
 0x6c8   :  { %v1529_v8 = vadd.f32 %v1527_v2, %v2827_v48 }
 0x6c9   :  { %v1522_v62 = vmul.f32 0.5, %v1521_v25 }
 0x6ca   :  { %v1530_v12 = vmul.f32 0.5, %v1529_v8 }
 0x6cb   :  { %2415 = vtanh.f32 %v1522_v62 }
 0x6cc   :  { %2417 = vtanh.f32 %v1530_v12 }
 0x6d5   :  { %v2416_v11 = vpop.eup %2415 }
 0x6d6   :  { %v1524_v1 = vmul.f32 0.5, %v2416_v11  ;;  %v2418_v24 = vpop.eup %2417 }
 0x6d7   :  { %v1532_v35 = vmul.f32 0.5, %v2418_v24 }
 0x6d8   :  { %v1525_v14 = vadd.f32 0.5, %v1524_v1 }
 0x6d9   :  { %v1533_v39 = vadd.f32 0.5, %v1532_v35 }
 0x6da   :  { %v1538_v20 = vmul.f32 %v1536_v17, %v1525_v14 }
 0x6dc   :  { %v1539_v13 = vadd.f32 %v1538_v20, %v2835_v60 }
 0x6de   :  { %2419 = vtanh.f32 %v1539_v13 }
 0x6e8   :  { %v2420_v26 = vpop.eup %2419 }
 0x6e9   :  { %v1542_v31 = vrot.slane %v2420_v26, 2 }
 0x6eb   :  { %v1544_v55 = vsub.f32 %v2916_v6, %v1542_v31 }
 0x6ed   :  { %v1546_v48 = vrot.slane %v1544_v55, 6 }
 0x6ef   :  { %v1548_v45 = vmul.f32 %v1546_v48, %v1533_v39 }
 0x6f1   :  { %v1549_v50 = vadd.f32 %v2420_v26, %v1548_v45 }
 0x6f3   :  { %v1551_v54 = vrot.slane %v1549_v50, 6  ;;  %v1641_v57 = vcombine.high %v1549_v50, %v1549_v50 }
 0x6f5   :  { %1986 = vmatmul.mubr.f32.vlgmr.msra.gmra.mrb[14].mxu1 %v1551_v54  ;;  %v1648_v60 = vrot.slane %v1641_v57, %v1647_v51 }
 0x6f7   :  { %v1649_v61 = vcombine.high %v1648_v60, %v1648_v60 }
 0x6f9   :  { %1651 = vst [vmem:[#allocation10 + $0x2] sm:$0x3] %v1649_v61 }
 0x7c8   :  { %v1619_v4 = vpop.f32.mrb[14].mxu1 }
 0x7c9   :  { %v1620_v7 = vadd.f32 %v1619_v4, %v267_v3  ;;  %v1987_v9 = vpop.f32.mrb[15].mxu1 }
 0x7cb   :  { %v1625_v6 = vsel %vm1624_vm13, %v1620_v7, -2e+10 }
 0x7cc   :  { %v1626_v15 = vsel %vm716_vm9, %v1625_v6, -inf }
 0x7cd   :  { %1627 = vmax.xlane.f32.xlu0 %v1626_v15 }
 0x85a   :  { %v1628_v21 = vpop.xlane.xlu0 %1627 }
 0x85b   :  { %v1629_v36 = vsub.f32 %v1625_v6, %v1628_v21 }
 0x85d   :  { %v1630_v16 = vmul.f32 1.442695, %v1629_v36 }
 0x85f   :  { %2421 = vpow2.f32 %v1630_v16 }
 0x869   :  { %v2422_v22 = vpop.eup %2421 }
 0x86a   :  { %v1632_v18 = vsel %vm716_vm9, %v2422_v22, 0.0 }
 0x86b   :  { %1633 = vadd.xlane.f32.xlu0 %v1632_v18 }
 0x8f8   :  { %v1634_v19 = vpop.xlane.xlu0 %1633 }
 0x8f9   :  { %2423 = vrcp.f32 %v1634_v19 }
 0x903   :  { %v2424_v27 = vpop.eup %2423 }
 0x904   :  { %v1636_v28 = vmul.f32 %v2424_v27, %v1634_v19 }
 0x906   :  { %v1637_v29 = vsub.f32 2.0, %v1636_v28 }
 0x908   :  { %v1638_v0 = vmul.f32 %v2424_v27, %v1637_v29 }
 0x90a   :  { %v1639_v30 = vmul.f32 %v2422_v22, %v1638_v0 }
 0x90c   :  { %1652 = vst [vmem:[#allocation10 + $0x4] sm:$0x3] %v1639_v30 }
 0x90d   :  { %2524 = shalt.err (!%p2521_p8)
}
 0x90e   :  { %s2525_s13 = scalar_lea.hbm %s2952_s4, 96 }
 0x90f   :  { %p2526_p9 = scmp.ne.s32.totalorder %s2952_s4, %s2525_s13  ;;  %p2529_p10 = scmp.lt.u32.totalorder %s2525_s13, %s2952_s4 }
 0x911   :  { %p2531_p11 = pnand %p2529_p10, %p2526_p9 }
 0x913   :  { %2534 = shalt.err (!%p2531_p11)
}
 0x914   :  { %1662 = dma.vmem_to_hbm [thread:$0]  %s1660_s10, 96, %s2952_s4, [#allocation4]  }
 0x915   :  { %2541 = dma.done.wait [#allocation4], 96  }
 0x916   :  { %2542 = vsyncadd [#allocation4], 4294967200 }
 0x917   :  { %1666 = vsyncpa [#allocation3], 1 }
 0x918   :  { %1667 = vsyncpa [#allocation6], 1 }
 0x919   :  { %1668 = vsyncpa [#allocation9], 1 }
 0x91a   :  { %1669 = vsyncpa [#allocation4], 1 }

</bundles_post_ra>
